<compile_context>
chip_gen: v7x
topology: tpu7x:2x2x1
jax: 0.10.0
libtpu: 0.0.40
codegen_flags: <defaults>
</compile_context>

<pallas_src>
import functools

import jax
import jax.numpy as jnp
from jax.experimental import pallas as pl
from jax.experimental.pallas import tpu as pltpu

LN_EPS = 1e-12
_NEG_INF = float("-inf")


def _round_up(x, m):
    return (x + m - 1) // m * m


def _pick_tm(T, tm):
    """Token tile: as large as requested, but guarantee >= 2 grid steps when
    possible so v7x's two TensorCores both get work on small batches."""
    return max(8, min(tm, _round_up(pl.cdiv(T, 2), 8)))


def _vmem_limit(block_bytes, headroom=4 * 1024 * 1024):
    """Per-kernel VMEM budget: working set + headroom, clamped to
    [16 MiB, 64 MiB] (64 MiB = v7x physical per-TensorCore VMEM)."""
    return int(min(max(block_bytes + headroom, 16 * 1024 * 1024),
                   64 * 1024 * 1024))


# ----------------------------------------------------------------------------
# 1) BertDecoder numeric core: argmax over the vocab (last) dim, vocab-tiled.
# ----------------------------------------------------------------------------
def _argmax_kernel(x_ref, o_ref, maxv_ref, arg_ref, *, vocab_size):
    # x_ref: (tm, tv) f32 logits tile.  o_ref: (tm, 1) i32.
    j = pl.program_id(1)

    @pl.when(j == 0)
    def _():
        maxv_ref[...] = jnp.full_like(maxv_ref, _NEG_INF)
        arg_ref[...] = jnp.zeros_like(arg_ref)

    x = x_ref[...]
    tv = x.shape[-1]
    idx = jax.lax.broadcasted_iota(jnp.int32, x.shape, 1) + j * tv
    # Ragged last vocab tile: mask columns past the true vocab to -inf.
    x = jnp.where(idx < vocab_size, x, _NEG_INF)

    tile_max = jnp.max(x, axis=-1, keepdims=True)                   # (tm, 1)
    big = jnp.iinfo(jnp.int32).max
    tile_arg = jnp.min(jnp.where(x == tile_max, idx, big),
                       axis=-1, keepdims=True)                      # first max in tile

    better = tile_max > maxv_ref[...]          # strict > keeps first occurrence
    arg_ref[...] = jnp.where(better, tile_arg, arg_ref[...])
    maxv_ref[...] = jnp.where(better, tile_max, maxv_ref[...])

    @pl.when(j == pl.num_programs(1) - 1)
    def _():
        o_ref[...] = arg_ref[...]


def bert_decoder_argmax(prediction, *, tm=128, tv=8192):
    """prediction: (B, S, V) f32 logits. Returns int32 ids of shape (B, S).
    Matches prediction.argmax(dim=-1) including first-occurrence tie-breaking."""
    B, S, V = prediction.shape
    T = B * S
    tm_eff = _pick_tm(T, tm)
    tv_eff = max(128, min(_round_up(tv, 128), _round_up(V, 128)))

    x2 = prediction.reshape(T, V)              # no wrapper-side pad or cast
    grid = (pl.cdiv(T, tm_eff), pl.cdiv(V, tv_eff))

    block_bytes = 2 * tm_eff * tv_eff * 4 + 2 * tm_eff * 4 + tm_eff * 8
    ids = pl.pallas_call(
        functools.partial(_argmax_kernel, vocab_size=V),
        out_shape=jax.ShapeDtypeStruct((T, 1), jnp.int32),
        grid_spec=pltpu.PrefetchScalarGridSpec(
            num_scalar_prefetch=0,
            grid=grid,
            in_specs=[pl.BlockSpec((tm_eff, tv_eff), lambda i, j: (i, j))],
            out_specs=pl.BlockSpec((tm_eff, 1), lambda i, j: (i, 0)),
            scratch_shapes=[pltpu.VMEM((tm_eff, 1), jnp.float32),
                            pltpu.VMEM((tm_eff, 1), jnp.int32)],
        ),
        compiler_params=pltpu.CompilerParams(
            dimension_semantics=("parallel", "arbitrary"),
            vmem_limit_bytes=_vmem_limit(block_bytes)),
    )(x2)
    return ids.reshape(B, S)


def bert_decoder_detokenize(ids_row, idx2word):
    """Host-side wordpiece join, identical to the PyTorch forward's string loop."""
    # TODO(synk): loading the real HuggingFace vocab file and the wordpiece join
    # are host-side Python (file I/O + strings) with no Pallas equivalent.
    out = ""
    for idx in ids_row:
        tok = idx2word[int(idx)]
        if "##" in tok:
            out += tok.replace("##", "")
        else:
            out += " " + tok
    return out


# ----------------------------------------------------------------------------
# 2) Fused decoder head: hidden @ W^T + bias -> argmax, logits never hit HBM.
# ----------------------------------------------------------------------------
def _fused_decoder_argmax_kernel(x_ref, w_ref, b_ref, o_ref, maxv_ref, arg_ref,
                                 *, vocab_size):
    # x_ref: (tm, H) f32 hidden, w_ref: (H, tv) bf16, b_ref: (1, tv) f32.
    j = pl.program_id(1)

    @pl.when(j == 0)
    def _():
        maxv_ref[...] = jnp.full_like(maxv_ref, _NEG_INF)
        arg_ref[...] = jnp.zeros_like(arg_ref)

    # Logits tile on the MXU with f32 accumulation; the bf16 cast of x is a
    # cheap VPU op hidden under the MXU.
    logits = jnp.dot(x_ref[...].astype(jnp.bfloat16), w_ref[...],
                     preferred_element_type=jnp.float32)
    logits = logits + b_ref[...]
    tv = logits.shape[-1]
    idx = jax.lax.broadcasted_iota(jnp.int32, logits.shape, 1) + j * tv
    logits = jnp.where(idx < vocab_size, logits, _NEG_INF)

    tile_max = jnp.max(logits, axis=-1, keepdims=True)
    big = jnp.iinfo(jnp.int32).max
    tile_arg = jnp.min(jnp.where(logits == tile_max, idx, big),
                       axis=-1, keepdims=True)

    better = tile_max > maxv_ref[...]
    arg_ref[...] = jnp.where(better, tile_arg, arg_ref[...])
    maxv_ref[...] = jnp.where(better, tile_max, maxv_ref[...])

    @pl.when(j == pl.num_programs(1) - 1)
    def _():
        o_ref[...] = arg_ref[...]


def prepare_decoder_params(decoder_w, decoder_b):
    """One-time prep (outside the hot path): PyTorch (V, H) Linear weight ->
    (H, V) bf16 for the MXU; bias stays f32."""
    V = decoder_w.shape[0]
    wT = jnp.asarray(decoder_w).T.astype(jnp.bfloat16)        # (H, V)
    b2 = jnp.asarray(decoder_b, jnp.float32).reshape(1, V)
    return wT, b2


def bert_decoder_fused_argmax(hidden, prepared, *, tm=128, tv=4096):
    """argmax over vocab of (hidden @ W^T + b) without materializing the
    (B, S, V) logits tensor in HBM."""
    wT, b2 = prepared
    B, S, H = hidden.shape
    Hw, V = wT.shape
    assert Hw == H
    T = B * S
    tm_eff = _pick_tm(T, tm)
    tv_eff = max(128, min(_round_up(tv, 128), _round_up(V, 128)))

    x2 = hidden.reshape(T, H)                  # f32 in; bf16 cast inside kernel
    grid = (pl.cdiv(T, tm_eff), pl.cdiv(V, tv_eff))

    block_bytes = (2 * tm_eff * H * 4          # x tile (double-buffered)
                   + 2 * H * tv_eff * 2        # weight tile bf16 (double-buffered)
                   + 2 * tv_eff * 4            # bias tile
                   + 2 * tm_eff * 4            # output
                   + tm_eff * 8                # scratch columns
                   + tm_eff * tv_eff * 4)      # in-kernel f32 logits tile
    ids = pl.pallas_call(
        functools.partial(_fused_decoder_argmax_kernel, vocab_size=V),
        out_shape=jax.ShapeDtypeStruct((T, 1), jnp.int32),
        grid_spec=pltpu.PrefetchScalarGridSpec(
            num_scalar_prefetch=0,
            grid=grid,
            in_specs=[
                pl.BlockSpec((tm_eff, H), lambda i, j: (i, 0)),   # hidden tile
                pl.BlockSpec((H, tv_eff), lambda i, j: (0, j)),   # weight slab
                pl.BlockSpec((1, tv_eff), lambda i, j: (0, j)),   # bias slab
            ],
            out_specs=pl.BlockSpec((tm_eff, 1), lambda i, j: (i, 0)),
            scratch_shapes=[pltpu.VMEM((tm_eff, 1), jnp.float32),
                            pltpu.VMEM((tm_eff, 1), jnp.int32)],
        ),
        compiler_params=pltpu.CompilerParams(
            dimension_semantics=("parallel", "arbitrary"),
            vmem_limit_bytes=_vmem_limit(block_bytes)),
    )(x2, wT, b2)
    return ids.reshape(B, S)


# ----------------------------------------------------------------------------
# 3) Upstream BERT prediction-head transform: dense -> tanh -> LayerNorm.
# ----------------------------------------------------------------------------
def _head_transform_kernel(x_ref, w_ref, b_ref, g_ref, beta_ref, o_ref):
    # x_ref: (tm, H) f32; w_ref: (H, H) bf16 (grid-invariant); rest (1, H) f32.
    x = x_ref[...].astype(jnp.bfloat16)                     # in-kernel cast
    h = jnp.dot(x, w_ref[...], preferred_element_type=jnp.float32)
    h = h + b_ref[...]                                      # f32 bias (VPU)
    h = jnp.tanh(h)                                         # f32 tanh (EUP)
    # One-pass LayerNorm stats (tanh output is bounded, so this is safe).
    mean = jnp.mean(h, axis=-1, keepdims=True)
    var = jnp.mean(h * h, axis=-1, keepdims=True) - mean * mean
    h = (h - mean) * jax.lax.rsqrt(var + LN_EPS)
    o_ref[...] = (h * g_ref[...] + beta_ref[...]).astype(o_ref.dtype)


def prepare_head_transform_params(dense_w, dense_b, ln_gamma, ln_beta):
    """One-time parameter prep (call OUTSIDE the hot path): PyTorch (out, in)
    weight -> (in, out) + bf16 cast for the MXU; LN/bias params stay f32."""
    H = dense_w.shape[0]
    wT = jnp.asarray(dense_w).T.astype(jnp.bfloat16)        # (in, out) bf16
    b2 = jnp.asarray(dense_b, jnp.float32).reshape(1, H)
    g2 = jnp.asarray(ln_gamma, jnp.float32).reshape(1, H)
    be2 = jnp.asarray(ln_beta, jnp.float32).reshape(1, H)
    return wT, b2, g2, be2


def bert_prediction_head_transform(x, prepared_params, *, tm=256,
                                   out_dtype=jnp.bfloat16):
    """x: (B, S, H) f32. Returns (B, S, H) in out_dtype (bf16 by default so the
    downstream vocab matmul consumes bf16 and writeback traffic is halved)."""
    wT, b2, g2, be2 = prepared_params
    B, S, H = x.shape
    T = B * S
    tm_eff = _pick_tm(T, tm)                   # >= 2 grid steps when possible
    x2 = x.reshape(T, H)                       # f32 in; no wrapper cast / pad

    grid = (pl.cdiv(T, tm_eff),)
    out_isz = jnp.dtype(out_dtype).itemsize
    block_bytes = (2 * tm_eff * H * 4          # x tile (double-buffered)
                   + 2 * H * H * 2             # weight (worst case double-buffered)
                   + 2 * 3 * H * 4             # bias / gamma / beta
                   + 2 * tm_eff * H * out_isz  # output tile
                   + 4 * tm_eff * H * 4)       # f32 intermediates
    vmem = _vmem_limit(block_bytes)

    def _run(weight_spec):
        return pl.pallas_call(
            _head_transform_kernel,
            out_shape=jax.ShapeDtypeStruct((T, H), out_dtype),
            grid_spec=pltpu.PrefetchScalarGridSpec(
                num_scalar_prefetch=0,
                grid=grid,
                in_specs=[
                    pl.BlockSpec((tm_eff, H), lambda i: (i, 0)),   # x tile (f32)
                    weight_spec,                                   # resident weight
                    pl.BlockSpec((1, H), lambda i: (0, 0)),        # bias
                    pl.BlockSpec((1, H), lambda i: (0, 0)),        # LN gamma
                    pl.BlockSpec((1, H), lambda i: (0, 0)),        # LN beta
                ],
                out_specs=pl.BlockSpec((tm_eff, H), lambda i: (i, 0)),
            ),
            compiler_params=pltpu.CompilerParams(
                dimension_semantics=("parallel",),                 # v7x: 2 TCs
                vmem_limit_bytes=vmem),
        )(x2, wT, b2, g2, be2)

    try:
        # Grid-invariant weight -> single buffer (saves one H*H bf16 copy).
        out = _run(pl.BlockSpec((H, H), lambda i: (0, 0),
                                pipeline_mode=pl.Buffered(1)))
    except Exception:
        # Fallback for jax versions without pipeline_mode support on TPU.
        out = _run(pl.BlockSpec((H, H), lambda i: (0, 0)))
    return out.reshape(B, S, H)


def _head_transform_reference(x, dense_w, dense_b, ln_gamma, ln_beta):
    # Same numerics as the kernel: bf16 operands, f32 accumulation, f32 LN.
    xb = x.astype(jnp.bfloat16)
    wb = dense_w.astype(jnp.bfloat16)
    h = jnp.einsum("bsh,oh->bso", xb, wb, preferred_element_type=jnp.float32)
    h = h + dense_b
    h = jnp.tanh(h)
    mean = jnp.mean(h, axis=-1, keepdims=True)
    var = jnp.mean((h - mean) ** 2, axis=-1, keepdims=True)
    return (h - mean) * jax.lax.rsqrt(var + LN_EPS) * ln_gamma + ln_beta


if __name__ == "__main__":
    key = jax.random.PRNGKey(0)
    kp, kh, kwd, kbd, kx, kw, kb, kg, kbe = jax.random.split(key, 9)

    # ---- BertDecoder forward: argmax over the vocab ----
    # V deliberately NOT a multiple of the vocab tile -> exercises the ragged
    # last-tile masking path (real BERT vocab 30522 behaves the same way).
    B, S, V, H = 2, 128, 1000, 128
    prediction = jax.random.normal(kp, (B, S, V), dtype=jnp.float32)
    ids = bert_decoder_argmax(prediction, tm=128, tv=256)    # 4 vocab tiles
    ids = jax.block_until_ready(ids)
    ref_ids = jnp.argmax(prediction, axis=-1).astype(jnp.int32)
    assert ids.shape == (B, S)
    assert bool(jnp.array_equal(ids, ref_ids)), "argmax mismatch vs reference"

    # Host-side detokenization with a tiny synthetic vocab (real vocab is a file).
    vocab = [("##p%d" % i) if i % 7 == 0 else ("tok%d" % i) for i in range(V)]
    idx2word = {i: w for i, w in enumerate(vocab)}
    text = bert_decoder_detokenize(ids[0], idx2word)
    assert isinstance(text, str) and len(text) > 0

    # ---- Fused decoder head: hidden @ W^T + b -> argmax (no HBM logits) ----
    hidden = jax.random.normal(kh, (B, S, H), dtype=jnp.float32)
    dec_w = jax.random.normal(kwd, (V, H), dtype=jnp.float32) * (1.0 / jnp.sqrt(H))
    dec_b = 0.02 * jax.random.normal(kbd, (V,), dtype=jnp.float32)
    prepared_dec = prepare_decoder_params(dec_w, dec_b)
    fused_ids = bert_decoder_fused_argmax(hidden, prepared_dec, tm=128, tv=256)
    fused_ids = jax.block_until_ready(fused_ids)

    ref_logits = jnp.dot(hidden.reshape(-1, H).astype(jnp.bfloat16),
                         prepared_dec[0],
                         preferred_element_type=jnp.float32) + dec_b
    ref_fids = jnp.argmax(ref_logits, axis=-1).astype(jnp.int32)
    fflat = fused_ids.reshape(-1)
    rows = jnp.arange(fflat.shape[0])
    lk = ref_logits[rows, fflat]
    lr = ref_logits[rows, ref_fids]
    near_tie = jnp.abs(lk - lr) <= 1e-3 * jnp.maximum(1.0, jnp.abs(lr))
    assert bool(jnp.all((fflat == ref_fids) | near_tie)), "fused argmax mismatch"

    # ---- Upstream prediction-head transform (dense -> tanh -> LayerNorm) ----
    x = jax.random.normal(kx, (B, S, H), dtype=jnp.float32)
    dense_w = jax.random.normal(kw, (H, H), dtype=jnp.float32) * (1.0 / jnp.sqrt(H))
    dense_b = 0.02 * jax.random.normal(kb, (H,), dtype=jnp.float32)
    ln_gamma = 1.0 + 0.01 * jax.random.normal(kg, (H,), dtype=jnp.float32)
    ln_beta = 0.01 * jax.random.normal(kbe, (H,), dtype=jnp.float32)

    prepared_head = prepare_head_transform_params(dense_w, dense_b, ln_gamma, ln_beta)
    out = bert_prediction_head_transform(x, prepared_head, tm=256)
    out = jax.block_until_ready(out)
    assert out.shape == (B, S, H)

    ref = _head_transform_reference(x, dense_w, dense_b, ln_gamma, ln_beta)
    assert jnp.allclose(out.astype(jnp.float32), ref, atol=3e-2, rtol=2e-2), \
        "head-transform mismatch vs reference"

    print("KERNEL_OK")
</pallas_src>

<mosaic_0001>
module attributes {stable_mosaic.version = 11 : i64} {
  func.func @_argmax_kernel(%arg0: i32, %arg1: i32, %arg2: memref<128x256xf32, #tpu.memory_space<vmem>>, %arg3: memref<128x1xi32, #tpu.memory_space<vmem>>, %arg4: memref<128x1xf32, #tpu.memory_space<vmem>>, %arg5: memref<128x1xi32, #tpu.memory_space<vmem>>) attributes {dimension_semantics = [#tpu.dimension_semantics<parallel>, #tpu.dimension_semantics<arbitrary>], iteration_bounds = array<i64: 2, 4>, scalar_prefetch = 0 : i64, scratch_operands = 2 : i64, tpu.core_type = #tpu.core_type<tc>, window_params = [{transform_indices = @transform_0, window_bounds = array<i64: 128, 256>}, {transform_indices = @transform_1, window_bounds = array<i64: 128, 1>}]} {
    %c0_i32 = arith.constant 0 : i32
    %0 = arith.cmpi eq, %arg1, %c0_i32 : i32
    %1 = arith.extui %0 : i1 to i32
    %c0_i32_0 = arith.constant 0 : i32
    %2 = arith.cmpi ne, %1, %c0_i32_0 : i32
    scf.if %2 {
      %cst_15 = arith.constant 0xFF800000 : f32
      %31 = vector.broadcast %cst_15 : f32 to vector<128x1xf32>
      %c0_16 = arith.constant 0 : index
      %c0_17 = arith.constant 0 : index
      %32 = vector.load %arg4[%c0_16, %c0_17] : memref<128x1xf32, #tpu.memory_space<vmem>>, vector<128x1xf32>
      tpu.vector_store %arg4[%c0_16, %c0_17], %31 {strides = array<i32>} : memref<128x1xf32, #tpu.memory_space<vmem>>, vector<128x1xf32>,
      %c0_i32_18 = arith.constant 0 : i32
      %33 = vector.broadcast %c0_i32_18 : i32 to vector<128x1xi32>
      %c0_19 = arith.constant 0 : index
      %c0_20 = arith.constant 0 : index
      %34 = vector.load %arg5[%c0_19, %c0_20] : memref<128x1xi32, #tpu.memory_space<vmem>>, vector<128x1xi32>
      tpu.vector_store %arg5[%c0_19, %c0_20], %33 {strides = array<i32>} : memref<128x1xi32, #tpu.memory_space<vmem>>, vector<128x1xi32>,
    } else {
    }
    %c0 = arith.constant 0 : index
    %c0_1 = arith.constant 0 : index
    %3 = vector.load %arg2[%c0, %c0_1] : memref<128x256xf32, #tpu.memory_space<vmem>>, vector<128x256xf32>
    %4 = tpu.iota {dimensions = array<i32: 1>} : vector<128x256xi32>
    %c256_i32 = arith.constant 256 : i32
    %5 = arith.muli %arg1, %c256_i32 : i32
    %6 = vector.broadcast %5 : i32 to vector<128x256xi32>
    %7 = arith.addi %4, %6 : vector<128x256xi32>
    %c1000_i32 = arith.constant 1000 : i32
    %8 = vector.broadcast %c1000_i32 : i32 to vector<128x256xi32>
    %9 = arith.cmpi slt, %7, %8 : vector<128x256xi32>
    %cst = arith.constant 0xFF800000 : f32
    %10 = vector.broadcast %cst : f32 to vector<128x256xf32>
    %11 = arith.select %9, %3, %10 : vector<128x256xi1>, vector<128x256xf32>
    %cst_2 = arith.constant dense<0xFF800000> : vector<128xf32>
    %12 = vector.multi_reduction <maximumf>, %11, %cst_2 [1] : vector<128x256xf32> to vector<128xf32>
    %13 = vector.shape_cast %12 : vector<128xf32> to vector<128x1xf32>
    %14 = vector.broadcast %13 : vector<128x1xf32> to vector<128x256xf32>
    %15 = arith.cmpf oeq, %11, %14 : vector<128x256xf32>
    %c2147483647_i32 = arith.constant 2147483647 : i32
    %16 = vector.broadcast %c2147483647_i32 : i32 to vector<128x256xi32>
    %17 = arith.select %15, %7, %16 : vector<128x256xi1>, vector<128x256xi32>
    %cst_3 = arith.constant dense<2147483647> : vector<128xi32>
    %18 = vector.multi_reduction <minsi>, %17, %cst_3 [1] : vector<128x256xi32> to vector<128xi32>
    %19 = vector.shape_cast %18 : vector<128xi32> to vector<128x1xi32>
    %c0_4 = arith.constant 0 : index
    %c0_5 = arith.constant 0 : index
    %20 = vector.load %arg4[%c0_4, %c0_5] : memref<128x1xf32, #tpu.memory_space<vmem>>, vector<128x1xf32>
    %21 = arith.cmpf ogt, %13, %20 : vector<128x1xf32>
    %c0_6 = arith.constant 0 : index
    %c0_7 = arith.constant 0 : index
    %22 = vector.load %arg5[%c0_6, %c0_7] : memref<128x1xi32, #tpu.memory_space<vmem>>, vector<128x1xi32>
    %23 = arith.select %21, %19, %22 : vector<128x1xi1>, vector<128x1xi32>
    %c0_8 = arith.constant 0 : index
    %c0_9 = arith.constant 0 : index
    %24 = vector.load %arg5[%c0_8, %c0_9] : memref<128x1xi32, #tpu.memory_space<vmem>>, vector<128x1xi32>
    tpu.vector_store %arg5[%c0_8, %c0_9], %23 {strides = array<i32>} : memref<128x1xi32, #tpu.memory_space<vmem>>, vector<128x1xi32>,
    %c0_10 = arith.constant 0 : index
    %c0_11 = arith.constant 0 : index
    %25 = vector.load %arg4[%c0_10, %c0_11] : memref<128x1xf32, #tpu.memory_space<vmem>>, vector<128x1xf32>
    %26 = arith.select %21, %13, %25 : vector<128x1xi1>, vector<128x1xf32>
    %c0_12 = arith.constant 0 : index
    %c0_13 = arith.constant 0 : index
    %27 = vector.load %arg4[%c0_12, %c0_13] : memref<128x1xf32, #tpu.memory_space<vmem>>, vector<128x1xf32>
    tpu.vector_store %arg4[%c0_12, %c0_13], %26 {strides = array<i32>} : memref<128x1xf32, #tpu.memory_space<vmem>>, vector<128x1xf32>,
    %c3_i32 = arith.constant 3 : i32
    %28 = arith.cmpi eq, %arg1, %c3_i32 : i32
    %29 = arith.extui %28 : i1 to i32
    %c0_i32_14 = arith.constant 0 : i32
    %30 = arith.cmpi ne, %29, %c0_i32_14 : i32
    scf.if %30 {
      %c0_15 = arith.constant 0 : index
      %c0_16 = arith.constant 0 : index
      %31 = vector.load %arg5[%c0_15, %c0_16] : memref<128x1xi32, #tpu.memory_space<vmem>>, vector<128x1xi32>
      %c0_17 = arith.constant 0 : index
      %c0_18 = arith.constant 0 : index
      %32 = vector.load %arg3[%c0_17, %c0_18] : memref<128x1xi32, #tpu.memory_space<vmem>>, vector<128x1xi32>
      tpu.vector_store %arg3[%c0_17, %c0_18], %31 {strides = array<i32>} : memref<128x1xi32, #tpu.memory_space<vmem>>, vector<128x1xi32>,
    } else {
    }
    return
  }
  func.func @transform_0(%arg0: i32, %arg1: i32) -> (i32, i32) {
    %c0_i32 = arith.constant 0 : i32
    return %arg0, %arg1 : i32, i32
  }
  func.func @transform_1(%arg0: i32, %arg1: i32) -> (i32, i32) {
    %c0_i32 = arith.constant 0 : i32
    %c0_i32_0 = arith.constant 0 : i32
    return %arg0, %c0_i32 : i32, i32
  }
}

</mosaic_0001>

<bundles_post_ra>
// kernel: tpu_custom_call.1
= control target key start
LH: loop header
LB: loop body
LE: loop exit
PB: predicated region body
PF: predicated region fallthrough
CT: control target
= control target key end

     0   :  { %s1084_s6 = smov 0   ;;  %s1086_s7 = smov 0   ;;  %s2135_s0 = inlined_call_operand.vmem [shape: f32[256,1000], index: 0, kind: input, shape index: {}]   ;;  %s2136_s1 = inlined_call_operand.vmem [shape: s32[256,1], index: 1, kind: output, shape index: {}]  }
   0x1   :  { %s1088_s8 = smov 0   ;;  %s1090_s9 = smov 0  }
   0x2   :  { %s1092_s10 = smov 0   ;;  %s1094_s11 = smov 0  }
   0x3   :  { %s1096_s12 = smov 0  }
   0x4 LB: > { %s20_s13 = sadd.s32 1, %s1062_s10  ;;  %s23_s14 = sadd.s32 1, %s1066_s11  ;;  %s1070_s12 = sphi %s1096_s12, %s11_s12   ;;  %s1066_s11 = sphi %s1094_s11, %s2198_s11   ;;  %s1062_s10 = sphi %s1092_s10, %s2197_s10   ;;  %s1058_s9 = sphi %s1090_s9, %s2196_s9   ;;  %s1054_s8 = sphi %s1088_s8, %s2195_s8   ;;  %s1050_s7 = sphi %s1086_s7, %s2194_s7   ;;  %s1046_s6 = sphi %s1084_s6, %s2193_s6  }
   0x5   : > { %p21_p0 = scmp.ge.s32.totalorder %s20_s13, 4  ;;  %p39_p1 = scmp.ne.s32.totalorder %s1050_s7, %s1046_s6 }
   0x6   : > { %p40_p2 = scmp.eq.s32.totalorder %s1070_s12, 0  ;;  %s32_s18 = sadd.s32 1, %s1050_s7 }
   0x7   : > { %s2200_s13 = smov (%p21_p0, %s20_s13), 0  ;;  %s2202_s14 = smov (!%p21_p0, %s23_s14), %s1066_s11 }
   0x8   : > { %p41_p3 = por %p40_p2, %p39_p1  ;;  %p25_p4 = scmp.ge.s32.totalorder %s2202_s14, 2 }
   0x9   : > { %s28_s15 = ssub.s32 %s1062_s10, %s2200_s13  ;;  %p942_p6 = scmp.ge.s32.totalorder %s1070_s12, 8 }
   0xa   : > { %s2204_s14 = smov (%p25_p4, %s2202_s14), 0 }
   0xb   : > { %s27_s16 = ssub.s32 %s1066_s11, %s2204_s14  ;;  %91 = sbr.rel (%p942_p6) target bundleno = 41 (0x29), region = 16 }
   0xc   : > { %s29_s17 = sor.u32 %s28_s15, %s27_s16 }
   0xd   : > { %p30_p5 = scmp.eq.s32.totalorder %s29_s17, 0 }
   0xf   : > { %s1135_s19 = scalar_select %p30_p5, %s1050_s7, %s32_s18  }
  0x12   : > { %94 = sbr.rel (!%p41_p3) target bundleno = 41 (0x29), region = 20  ;;  %s96_s20 = sand.u32 (%p41_p3), 1, %s1050_s7  }
  0x13   : > { %s945_s21 = sshll.u32 (%p41_p3), %s1062_s10, 1  ;;  %s943_s22 = sshll.u32 (%p41_p3), %s96_s20, 8 }
  0x14   : > { %s957_s23 = sshll.u32 (%p41_p3), %s1066_s11, 7  ;;  %s1149_s29 = scalar_lea.vmem (%p41_p3), [#allocation4], %s943_s22 }
  0x15   : > { %s102_s24 = sadd.s32 (%p41_p3), %s957_s23, %s945_s21 }
  0x16   : > { %s947_s25 = sshll.u32 (%p41_p3), %s102_s24, 3 }
  0x17   : > { %s1144_s28 = scalar_lea.vmem (%p41_p3), %s2135_s0, %s947_s25 }
  0x18   : > { %v117_v0 = vld [vmem:[%s1144_s28] sm:$0xff] (%p41_p3)  ;;  %v119_v1 = vld [vmem:[%s1144_s28 + $0x8] sm:$0xff] (%p41_p3) }
  0x19   : > { %v121_v2 = vld [vmem:[%s1144_s28 + $0x40] sm:$0xff]  ;;  %118 = vst [vmem:[%s1149_s29] sm:$0xff] %v117_v0  ;;  %120 = vst [vmem:[%s1149_s29 + $0x8] sm:$0xff] %v119_v1  ;;  %v123_v3 = vld [vmem:[%s1144_s28 + $0x48] sm:$0xff] }
  0x1a   : > { %122 = vst [vmem:[%s1149_s29 + $0x10] sm:$0xff] %v121_v2  ;;  %v125_v4 = vld [vmem:[%s1144_s28 + $0x80] sm:$0xff]  ;;  %v127_v5 = vld [vmem:[%s1144_s28 + $0x88] sm:$0xff]  ;;  %124 = vst [vmem:[%s1149_s29 + $0x18] sm:$0xff] %v123_v3 }
  0x1b   : > { %126 = vst [vmem:[%s1149_s29 + $0x20] sm:$0xff] %v125_v4  ;;  %128 = vst [vmem:[%s1149_s29 + $0x28] sm:$0xff] %v127_v5  ;;  %v129_v6 = vld [vmem:[%s1144_s28 + $0xc0] sm:$0xff]  ;;  %v131_v7 = vld [vmem:[%s1144_s28 + $0xc8] sm:$0xff] }
  0x1c   : > { %v133_v8 = vld [vmem:[%s1144_s28 + $0x100] sm:$0xff]  ;;  %130 = vst [vmem:[%s1149_s29 + $0x30] sm:$0xff] %v129_v6  ;;  %132 = vst [vmem:[%s1149_s29 + $0x38] sm:$0xff] %v131_v7  ;;  %v135_v9 = vld [vmem:[%s1144_s28 + $0x108] sm:$0xff] }
  0x1d   : > { %134 = vst [vmem:[%s1149_s29 + $0x40] sm:$0xff] %v133_v8  ;;  %v137_v10 = vld [vmem:[%s1144_s28 + $0x140] sm:$0xff]  ;;  %v139_v11 = vld [vmem:[%s1144_s28 + $0x148] sm:$0xff]  ;;  %136 = vst [vmem:[%s1149_s29 + $0x48] sm:$0xff] %v135_v9 }
  0x1e   : > { %138 = vst [vmem:[%s1149_s29 + $0x50] sm:$0xff] %v137_v10  ;;  %140 = vst [vmem:[%s1149_s29 + $0x58] sm:$0xff] %v139_v11  ;;  %v141_v12 = vld [vmem:[%s1144_s28 + $0x180] sm:$0xff]  ;;  %v143_v13 = vld [vmem:[%s1144_s28 + $0x188] sm:$0xff] }
  0x1f   : > { %v145_v14 = vld [vmem:[%s1144_s28 + $0x1c0] sm:$0xff]  ;;  %142 = vst [vmem:[%s1149_s29 + $0x60] sm:$0xff] %v141_v12  ;;  %144 = vst [vmem:[%s1149_s29 + $0x68] sm:$0xff] %v143_v13  ;;  %v147_v15 = vld [vmem:[%s1144_s28 + $0x1c8] sm:$0xff] }
  0x20   : > { %146 = vst [vmem:[%s1149_s29 + $0x70] sm:$0xff] %v145_v14  ;;  %v149_v16 = vld [vmem:[%s1144_s28 + $0x200] sm:$0xff]  ;;  %v151_v17 = vld [vmem:[%s1144_s28 + $0x208] sm:$0xff]  ;;  %148 = vst [vmem:[%s1149_s29 + $0x78] sm:$0xff] %v147_v15 }
  0x21   : > { %150 = vst [vmem:[%s1149_s29 + $0x80] sm:$0xff] %v149_v16  ;;  %152 = vst [vmem:[%s1149_s29 + $0x88] sm:$0xff] %v151_v17  ;;  %v153_v18 = vld [vmem:[%s1144_s28 + $0x240] sm:$0xff]  ;;  %v155_v19 = vld [vmem:[%s1144_s28 + $0x248] sm:$0xff] }
  0x22   : > { %v157_v20 = vld [vmem:[%s1144_s28 + $0x280] sm:$0xff]  ;;  %154 = vst [vmem:[%s1149_s29 + $0x90] sm:$0xff] %v153_v18  ;;  %156 = vst [vmem:[%s1149_s29 + $0x98] sm:$0xff] %v155_v19  ;;  %v159_v21 = vld [vmem:[%s1144_s28 + $0x288] sm:$0xff] }
  0x23   : > { %158 = vst [vmem:[%s1149_s29 + $0xa0] sm:$0xff] %v157_v20  ;;  %v161_v22 = vld [vmem:[%s1144_s28 + $0x2c0] sm:$0xff]  ;;  %v163_v23 = vld [vmem:[%s1144_s28 + $0x2c8] sm:$0xff]  ;;  %160 = vst [vmem:[%s1149_s29 + $0xa8] sm:$0xff] %v159_v21 }
  0x24   : > { %162 = vst [vmem:[%s1149_s29 + $0xb0] sm:$0xff] %v161_v22  ;;  %164 = vst [vmem:[%s1149_s29 + $0xb8] sm:$0xff] %v163_v23  ;;  %v165_v24 = vld [vmem:[%s1144_s28 + $0x300] sm:$0xff]  ;;  %v167_v25 = vld [vmem:[%s1144_s28 + $0x308] sm:$0xff] }
  0x25   : > { %v169_v26 = vld [vmem:[%s1144_s28 + $0x340] sm:$0xff]  ;;  %166 = vst [vmem:[%s1149_s29 + $0xc0] sm:$0xff] %v165_v24  ;;  %168 = vst [vmem:[%s1149_s29 + $0xc8] sm:$0xff] %v167_v25  ;;  %v171_v27 = vld [vmem:[%s1144_s28 + $0x348] sm:$0xff] }
  0x26   : > { %170 = vst [vmem:[%s1149_s29 + $0xd0] sm:$0xff] %v169_v26  ;;  %v173_v28 = vld [vmem:[%s1144_s28 + $0x380] sm:$0xff]  ;;  %v175_v29 = vld [vmem:[%s1144_s28 + $0x388] sm:$0xff]  ;;  %172 = vst [vmem:[%s1149_s29 + $0xd8] sm:$0xff] %v171_v27 }
  0x27   : > { %174 = vst [vmem:[%s1149_s29 + $0xe0] sm:$0xff] %v173_v28  ;;  %176 = vst [vmem:[%s1149_s29 + $0xe8] sm:$0xff] %v175_v29  ;;  %v177_v30 = vld [vmem:[%s1144_s28 + $0x3c0] sm:$0xff]  ;;  %v179_v31 = vld [vmem:[%s1144_s28 + $0x3c8] sm:$0xff] }
  0x28   : > { %178 = vst [vmem:[%s1149_s29 + $0xf0] sm:$0xff] %v177_v30  ;;  %180 = vst [vmem:[%s1149_s29 + $0xf8] sm:$0xff] %v179_v31 }
  0x29 PF: > { %p948_p7 = scmp.ge.s32.totalorder %s1070_s12, 1  ;;  %p185_p8 = scmp.lt.s32.totalorder %s1070_s12, 9 }
  0x2b   : > { %p186_p9 = pnand %p948_p7, %p185_p8 }
  0x2d   : > { %189 = sbr.rel (%p186_p9) target bundleno = 574 (0x23e), region = 43 }
  0x34   : > { %s192_s30 = sand.u32 1, %s1046_s6   ;;  %s950_s2 = sshll.u32 %s1058_s9, 4 }
  0x35   : > { %s949_s3 = sshll.u32 %s192_s30, 8  ;;  %p214_p10 = scmp.lt.s32.totalorder %s950_s2, 31 }
  0x36   : > { %s1221_s17 = scalar_lea.vmem [#allocation4], %s949_s3  ;;  %p952_p11 = scmp.ne.s32.totalorder %s1054_s8, 0 }
  0x37   : > { %s2206_s2 = smov (!%p214_p10, %s950_s2), 31  ;;  %vm223_vm0 = vcmask (!%p952_p11), 7168   ;;  %v1072_v32 = vmov (!%p952_p11), -inf   ;;  %v1073_v33 = vmov (!%p952_p11), 0  }
  0x38   : > { %s951_s4 = sshll.u32 %s2206_s2, 3  ;;  %222 = sbr.rel (%p952_p11) target bundleno = 72 (0x48), region = 51  ;;  %224 = vst.msk [vmem:[#allocation2] sm:$0xff] (!%p952_p11), %vm223_vm0, %v1072_v32  ;;  %225 = vst.msk [vmem:[#allocation2 + $0x8] sm:$0xff] (!%p952_p11), %vm223_vm0, %v1072_v32 }
  0x39   : > { %s1219_s16 = scalar_lea.vmem %s2136_s1, %s951_s4  ;;  %226 = vst.msk [vmem:[#allocation2 + $0x10] sm:$0xff] (!%p952_p11), %vm223_vm0, %v1072_v32  ;;  %227 = vst.msk [vmem:[#allocation2 + $0x18] sm:$0xff] (!%p952_p11), %vm223_vm0, %v1072_v32 }
  0x3a   : > { %228 = vst.msk [vmem:[#allocation2 + $0x20] sm:$0xff] (!%p952_p11), %vm223_vm0, %v1072_v32  ;;  %229 = vst.msk [vmem:[#allocation2 + $0x28] sm:$0xff] (!%p952_p11), %vm223_vm0, %v1072_v32 }
  0x3b   : > { %230 = vst.msk [vmem:[#allocation2 + $0x30] sm:$0xff] (!%p952_p11), %vm223_vm0, %v1072_v32  ;;  %231 = vst.msk [vmem:[#allocation2 + $0x38] sm:$0xff] (!%p952_p11), %vm223_vm0, %v1072_v32 }
  0x3c   : > { %232 = vst.msk [vmem:[#allocation2 + $0x40] sm:$0xff] (!%p952_p11), %vm223_vm0, %v1072_v32  ;;  %233 = vst.msk [vmem:[#allocation2 + $0x48] sm:$0xff] (!%p952_p11), %vm223_vm0, %v1072_v32 }
  0x3d   : > { %234 = vst.msk [vmem:[#allocation2 + $0x50] sm:$0xff] (!%p952_p11), %vm223_vm0, %v1072_v32  ;;  %235 = vst.msk [vmem:[#allocation2 + $0x58] sm:$0xff] (!%p952_p11), %vm223_vm0, %v1072_v32 }
  0x3e   : > { %236 = vst.msk [vmem:[#allocation2 + $0x60] sm:$0xff] (!%p952_p11), %vm223_vm0, %v1072_v32  ;;  %237 = vst.msk [vmem:[#allocation2 + $0x68] sm:$0xff] (!%p952_p11), %vm223_vm0, %v1072_v32 }
  0x3f   : > { %238 = vst.msk [vmem:[#allocation2 + $0x70] sm:$0xff] %vm223_vm0, %v1072_v32  ;;  %239 = vst.msk [vmem:[#allocation2 + $0x78] sm:$0xff] %vm223_vm0, %v1072_v32 }
  0x40   : > { %240 = vst.msk [vmem:[#allocation3] sm:$0xff] %vm223_vm0, %v1073_v33  ;;  %241 = vst.msk [vmem:[#allocation3 + $0x8] sm:$0xff] %vm223_vm0, %v1073_v33 }
  0x41   : > { %242 = vst.msk [vmem:[#allocation3 + $0x10] sm:$0xff] %vm223_vm0, %v1073_v33  ;;  %243 = vst.msk [vmem:[#allocation3 + $0x18] sm:$0xff] %vm223_vm0, %v1073_v33 }
  0x42   : > { %244 = vst.msk [vmem:[#allocation3 + $0x20] sm:$0xff] %vm223_vm0, %v1073_v33  ;;  %245 = vst.msk [vmem:[#allocation3 + $0x28] sm:$0xff] %vm223_vm0, %v1073_v33 }
  0x43   : > { %246 = vst.msk [vmem:[#allocation3 + $0x30] sm:$0xff] %vm223_vm0, %v1073_v33  ;;  %247 = vst.msk [vmem:[#allocation3 + $0x38] sm:$0xff] %vm223_vm0, %v1073_v33 }
  0x44   : > { %248 = vst.msk [vmem:[#allocation3 + $0x40] sm:$0xff] %vm223_vm0, %v1073_v33  ;;  %249 = vst.msk [vmem:[#allocation3 + $0x48] sm:$0xff] %vm223_vm0, %v1073_v33 }
  0x45   : > { %250 = vst.msk [vmem:[#allocation3 + $0x50] sm:$0xff] %vm223_vm0, %v1073_v33  ;;  %251 = vst.msk [vmem:[#allocation3 + $0x58] sm:$0xff] %vm223_vm0, %v1073_v33 }
  0x46   : > { %252 = vst.msk [vmem:[#allocation3 + $0x60] sm:$0xff] %vm223_vm0, %v1073_v33  ;;  %253 = vst.msk [vmem:[#allocation3 + $0x68] sm:$0xff] %vm223_vm0, %v1073_v33 }
  0x47   : > { %254 = vst.msk [vmem:[#allocation3 + $0x70] sm:$0xff] %vm223_vm0, %v1073_v33  ;;  %255 = vst.msk [vmem:[#allocation3 + $0x78] sm:$0xff] %vm223_vm0, %v1073_v33 }
  0x48 PF: > { %v288_v34 = vlaneseq  ;;  %s953_s6 = sshll.u32 %s1054_s8, 8  ;;  %v256_v37 = vld [vmem:[%s1221_s17] sm:$0xff]  ;;  %v257_v41 = vld [vmem:[%s1221_s17 + $0x8] sm:$0xff]  ;;  %v258_v42 = vld [vmem:[%s1221_s17 + $0x10] sm:$0xff]  ;;  %vm761_vm3 = vcmask 7168   ;;  %p954_p12 = scmp.ne.s32.totalorder %s1054_s8, 3 }
  0x49   : > { %v292_v35 = vstv %s953_s6  ;;  %v260_v40 = vld [vmem:[%s1221_s17 + $0x20] sm:$0xff]  ;;  %v262_v43 = vld [vmem:[%s1221_s17 + $0x30] sm:$0xff]  ;;  %v261_v45 = vld [vmem:[%s1221_s17 + $0x28] sm:$0xff] }
  0x4a   : > { %v289_v36 = vand.u32 127, %v288_v34  ;;  %v259_v46 = vld [vmem:[%s1221_s17 + $0x18] sm:$0xff]  ;;  %v264_v56 = vld [vmem:[%s1221_s17 + $0x40] sm:$0xff]  ;;  %v265_v59 = vld [vmem:[%s1221_s17 + $0x48] sm:$0xff] }
  0x4b   : > { %v263_v47 = vld [vmem:[%s1221_s17 + $0x38] sm:$0xff]  ;;  %v266_v60 = vld [vmem:[%s1221_s17 + $0x50] sm:$0xff]  ;;  %v268_v4 = vld [vmem:[%s1221_s17 + $0x60] sm:$0xff] }
  0x4c   : > { %v290_v38 = vadd.s32 128, %v289_v36  ;;  %v1258_v39 = vadd.s32 %v292_v35, %v289_v36  ;;  %v267_v61 = vld [vmem:[%s1221_s17 + $0x58] sm:$0xff]  ;;  %v269_v5 = vld [vmem:[%s1221_s17 + $0x68] sm:$0xff]  ;;  %v270_v6 = vld [vmem:[%s1221_s17 + $0x70] sm:$0xff] }
  0x4d   : > { %v271_v7 = vld [vmem:[%s1221_s17 + $0x78] sm:$0xff]  ;;  %v272_v14 = vld [vmem:[%s1221_s17 + $0x80] sm:$0xff]  ;;  %v273_v15 = vld [vmem:[%s1221_s17 + $0x88] sm:$0xff] }
  0x4e   : > { %v1264_v44 = vadd.s32 %v292_v35, %v290_v38  ;;  %vm295_vm1 = vcmp.lt.s32.totalorder %v1258_v39, 1000  ;;  %v274_v16 = vld [vmem:[%s1221_s17 + $0x90] sm:$0xff]  ;;  %v275_v17 = vld [vmem:[%s1221_s17 + $0x98] sm:$0xff]  ;;  %v276_v24 = vld [vmem:[%s1221_s17 + $0xa0] sm:$0xff] }
  0x4f   : > { %v1272_v48 = vsel %vm295_vm1, %v256_v37, -inf  ;;  %v1276_v49 = vsel %vm295_vm1, %v260_v40, -inf  ;;  %v1281_v50 = vsel %vm295_vm1, %v258_v42, -inf  ;;  %v1285_v51 = vsel %vm295_vm1, %v262_v43, -inf  ;;  %v277_v25 = vld [vmem:[%s1221_s17 + $0xa8] sm:$0xff]  ;;  %v278_v26 = vld [vmem:[%s1221_s17 + $0xb0] sm:$0xff] }
  0x50   : > { %vm296_vm2 = vcmp.lt.s32.totalorder %v1264_v44, 1000  ;;  %v1317_v0 = vsel %vm295_vm1, %v264_v56, -inf  ;;  %v1325_v2 = vsel %vm295_vm1, %v266_v60, -inf  ;;  %v1341_v10 = vsel %vm295_vm1, %v268_v4, -inf  ;;  %v279_v27 = vld [vmem:[%s1221_s17 + $0xb8] sm:$0xff]  ;;  %v280_v34 = vld [vmem:[%s1221_s17 + $0xc0] sm:$0xff] }
  0x51   : > { %v1289_v52 = vsel %vm296_vm2, %v257_v41, -inf  ;;  %v1293_v53 = vsel %vm296_vm2, %v261_v45, -inf  ;;  %v1297_v54 = vsel %vm296_vm2, %v259_v46, -inf  ;;  %v1301_v55 = vsel %vm296_vm2, %v263_v47, -inf  ;;  %v281_v35 = vld [vmem:[%s1221_s17 + $0xc8] sm:$0xff]  ;;  %v282_v36 = vld [vmem:[%s1221_s17 + $0xd0] sm:$0xff] }
  0x52   : > { %v329_v57 = vmax.f32 %v1272_v48, %v1289_v52  ;;  %v335_v58 = vmax.f32 %v1276_v49, %v1293_v53  ;;  %v332_v62 = vmax.f32 %v1281_v50, %v1297_v54  ;;  %v338_v63 = vmax.f32 %v1285_v51, %v1301_v55  ;;  %v283_v37 = vld [vmem:[%s1221_s17 + $0xd8] sm:$0xff]  ;;  %v284_v46 = vld [vmem:[%s1221_s17 + $0xe0] sm:$0xff]  ;;  %v285_v47 = vld [vmem:[%s1221_s17 + $0xe8] sm:$0xff] }
  0x53   : > { %v1321_v1 = vsel %vm296_vm2, %v265_v59, -inf  ;;  %v1329_v3 = vsel %vm296_vm2, %v267_v61, -inf  ;;  %v1345_v11 = vsel %vm296_vm2, %v269_v5, -inf  ;;  %v1349_v12 = vsel %vm295_vm1, %v270_v6, -inf  ;;  %v286_v56 = vld [vmem:[%s1221_s17 + $0xf0] sm:$0xff]  ;;  %v1455_v6 = vld [vmem:[#allocation2] sm:$0xff] }
  0x54   : > { %330 = vmax.xlane.f32.xlu0 %v329_v57  ;;  %336 = vmax.xlane.f32.xlu1 %v335_v58  ;;  %v341_v8 = vmax.f32 %v1317_v0, %v1321_v1  ;;  %v344_v9 = vmax.f32 %v1325_v2, %v1329_v3  ;;  %v1353_v13 = vsel %vm296_vm2, %v271_v7, -inf  ;;  %v347_v18 = vmax.f32 %v1341_v10, %v1345_v11  ;;  %v287_v57 = vld [vmem:[%s1221_s17 + $0xf8] sm:$0xff]  ;;  %v1457_v7 = vld [vmem:[#allocation2 + $0x10] sm:$0xff] }
  0x55   : > { %v350_v19 = vmax.f32 %v1349_v12, %v1353_v13  ;;  %v1365_v20 = vsel %vm295_vm1, %v272_v14, -inf  ;;  %v1369_v21 = vsel %vm296_vm2, %v273_v15, -inf  ;;  %v1373_v22 = vsel %vm295_vm1, %v274_v16, -inf }
  0x56   : > { %v1377_v23 = vsel %vm296_vm2, %v275_v17, -inf  ;;  %v353_v28 = vmax.f32 %v1365_v20, %v1369_v21  ;;  %v1389_v30 = vsel %vm295_vm1, %v276_v24, -inf  ;;  %v1393_v31 = vsel %vm296_vm2, %v277_v25, -inf  ;;  %v1514_v25 = vld [vmem:[#allocation2 + $0x20] sm:$0xff] }
  0x57   : > { %v356_v29 = vmax.f32 %v1373_v22, %v1377_v23  ;;  %v1397_v32 = vsel %vm295_vm1, %v278_v26, -inf  ;;  %v1401_v33 = vsel %vm296_vm2, %v279_v27, -inf  ;;  %v359_v38 = vmax.f32 %v1389_v30, %v1393_v31 }
  0x58   : > { %333 = vmax.xlane.f32.xlu0 %v332_v62  ;;  %339 = vmax.xlane.f32.xlu1 %v338_v63  ;;  %v362_v40 = vmax.f32 %v1397_v32, %v1401_v33  ;;  %v1413_v41 = vsel %vm295_vm1, %v280_v34, -inf  ;;  %v1417_v42 = vsel %vm296_vm2, %v281_v35, -inf  ;;  %v1421_v43 = vsel %vm295_vm1, %v282_v36, -inf }
  0x59   : > { %v1425_v45 = vsel %vm296_vm2, %v283_v37, -inf  ;;  %v365_v58 = vmax.f32 %v1413_v41, %v1417_v42  ;;  %v1437_v60 = vsel %vm295_vm1, %v284_v46, -inf  ;;  %v1441_v61 = vsel %vm296_vm2, %v285_v47, -inf }
  0x5a   : > { %v368_v59 = vmax.f32 %v1421_v43, %v1425_v45  ;;  %v1445_v62 = vsel %vm295_vm1, %v286_v56, -inf  ;;  %v1449_v63 = vsel %vm296_vm2, %v287_v57, -inf  ;;  %v371_v4 = vmax.f32 %v1437_v60, %v1441_v61  ;;  %v1574_v57 = vld [vmem:[#allocation2 + $0x38] sm:$0xff] }
  0x5b   : > { %v374_v5 = vmax.f32 %v1445_v62, %v1449_v63 }
  0x5c   : > { %342 = vmax.xlane.f32.xlu0 %v341_v8  ;;  %345 = vmax.xlane.f32.xlu1 %v344_v9 }
  0x60   : > { %348 = vmax.xlane.f32.xlu0 %v347_v18  ;;  %351 = vmax.xlane.f32.xlu1 %v350_v19 }
  0x64   : > { %354 = vmax.xlane.f32.xlu0 %v353_v28  ;;  %357 = vmax.xlane.f32.xlu1 %v356_v29  ;;  %v1525_v28 = vld [vmem:[#allocation2 + $0x28] sm:$0xff] }
  0x68   : > { %360 = vmax.xlane.f32.xlu0 %v359_v38  ;;  %363 = vmax.xlane.f32.xlu1 %v362_v40 }
  0x6c   : > { %366 = vmax.xlane.f32.xlu0 %v365_v58  ;;  %369 = vmax.xlane.f32.xlu1 %v368_v59 }
  0x70   : > { %372 = vmax.xlane.f32.xlu0 %v371_v4  ;;  %375 = vmax.xlane.f32.xlu1 %v374_v5 }
  0xe1   : > { %v1459_v8 = vpop.xlane.xlu0 %330  ;;  %v1461_v9 = vpop.xlane.xlu1 %336 }
  0xe2   : > { %vm377_vm4 = vcmp.eq.f32.partialorder %v1272_v48, %v1459_v8  ;;  %vm378_vm5 = vcmp.eq.f32.partialorder %v1289_v52, %v1459_v8  ;;  %vm713_vm6 = vcmp.gt.f32.partialorder %v1459_v8, %v1455_v6  ;;  %vm381_vm7 = vcmp.eq.f32.partialorder %v1276_v49, %v1461_v9  ;;  %v1480_v48 = vld [vmem:[#allocation2 + $0x8] sm:$0xff]  ;;  %v1482_v52 = vld [vmem:[#allocation2 + $0x18] sm:$0xff] }
  0xe3   : > { %v794_v14 = vsel %vm713_vm6, %v1459_v8, %v1455_v6  ;;  %vm382_vm8 = vcmp.eq.f32.partialorder %v1293_v53, %v1461_v9  ;;  %vm715_vm9 = vcmp.gt.f32.partialorder %v1461_v9, %v1457_v7  ;;  %v409_v15 = vsel %vm377_vm4, %v1258_v39, 2147483647 }
  0xe4   : > { %810 = vst.msk [vmem:[#allocation2] sm:$0xff] %vm761_vm3, %v794_v14  ;;  %v796_v49 = vsel %vm715_vm9, %v1461_v9, %v1457_v7  ;;  %v410_v16 = vsel %vm378_vm5, %v1264_v44, 2147483647  ;;  %v413_v53 = vsel %vm381_vm7, %v1258_v39, 2147483647 }
  0xe5   : > { %v414_v17 = vsel %vm382_vm8, %v1264_v44, 2147483647  ;;  %812 = vst.msk [vmem:[#allocation2 + $0x10] sm:$0xff] %vm761_vm3, %v796_v49  ;;  %v1495_v18 = vpop.xlane.xlu0 %333  ;;  %v1497_v19 = vpop.xlane.xlu1 %339  ;;  %vm441_vm10 = vcmp.lt.s32.totalorder %v409_v15, %v410_v16 }
  0xe6   : > { %vm473_vm11 = vcmp.lt.s32.totalorder %v413_v53, %v414_v17  ;;  %vm379_vm12 = vcmp.eq.f32.partialorder %v1281_v50, %v1495_v18  ;;  %vm380_vm13 = vcmp.eq.f32.partialorder %v1297_v54, %v1495_v18  ;;  %vm2156_vm14 = vcmp.gt.f32.partialorder %v1495_v18, %v1480_v48 }
  0xe7   : > { %vm383_vm15 = vcmp.eq.f32.partialorder %v1285_v51, %v1497_v19  ;;  %v795_v24 = vsel %vm2156_vm14, %v1495_v18, %v1480_v48  ;;  %vm2149_vm0 = vcmp.gt.f32.partialorder %v1497_v19, %v1482_v52  ;;  %v1516_v50 = vsel %vm441_vm10, %v409_v15, %v410_v16  ;;  %v1563_v51 = vld [vmem:[#allocation2 + $0x30] sm:$0xff] }
  0xe8   : > { %811 = vst.msk [vmem:[#allocation2 + $0x8] sm:$0xff] %vm761_vm3, %v795_v24  ;;  %v797_v26 = vsel %vm2149_vm0, %v1497_v19, %v1482_v52  ;;  %v444_v27 = vshra.s32 %v1516_v50, 16  ;;  %v1527_v29 = vsel %vm473_vm11, %v413_v53, %v414_v17  ;;  %v411_v34 = vsel %vm379_vm12, %v1258_v39, 2147483647 }
  0xe9   : > { %vm384_vm1 = vcmp.eq.f32.partialorder %v1301_v55, %v1497_v19  ;;  %813 = vst.msk [vmem:[#allocation2 + $0x18] sm:$0xff] %vm761_vm3, %v797_v26  ;;  %v1533_v35 = vpop.xlane.xlu0 %342  ;;  %v1535_v36 = vpop.xlane.xlu1 %345  ;;  %v476_v37 = vshra.s32 %v1527_v29, 16  ;;  %v412_v38 = vsel %vm380_vm13, %v1264_v44, 2147483647  ;;  %v415_v40 = vsel %vm383_vm15, %v1258_v39, 2147483647 }
  0xea   : > { %vm385_vm2 = vcmp.eq.f32.partialorder %v1317_v0, %v1533_v35  ;;  %vm386_vm4 = vcmp.eq.f32.partialorder %v1321_v1, %v1533_v35  ;;  %vm2142_vm5 = vcmp.gt.f32.partialorder %v1533_v35, %v1514_v25  ;;  %v1552_v46 = vcvt.s32.f32 %v444_v27  ;;  %v1613_v1 = vld [vmem:[#allocation2 + $0x40] sm:$0xff]  ;;  %v1633_v27 = vld [vmem:[#allocation2 + $0x48] sm:$0xff] }
  0xeb   : > { %v798_v54 = vsel %vm2142_vm5, %v1533_v35, %v1514_v25  ;;  %vm387_vm7 = vcmp.eq.f32.partialorder %v1325_v2, %v1535_v36  ;;  %vm2139_vm8 = vcmp.gt.f32.partialorder %v1535_v36, %v1525_v28  ;;  %v1572_v56 = vcvt.s32.f32 %v476_v37  ;;  %2160 = vst [vmem:[#allocation5_spill] sm:$0xff] %v1613_v1  ;;  %2162 = vst [vmem:[#allocation7_spill] sm:$0xff] %v1633_v27 }
  0xec   : > { %814 = vst.msk [vmem:[#allocation2 + $0x20] sm:$0xff] %vm761_vm3, %v798_v54  ;;  %447 = vmin.xlane.f32.xlu0 %v1552_v46  ;;  %v799_v47 = vsel %vm2139_vm8, %v1535_v36, %v1525_v28  ;;  %vm457_vm10 = vcmp.lt.s32.totalorder %v411_v34, %v412_v38  ;;  %v416_v58 = vsel %vm384_vm1, %v1264_v44, 2147483647  ;;  %v417_v14 = vsel %vm385_vm2, %v1258_v39, 2147483647  ;;  %v1664_v54 = vld [vmem:[#allocation2 + $0x50] sm:$0xff] }
  0xed   : > { %815 = vst.msk [vmem:[#allocation2 + $0x28] sm:$0xff] %vm761_vm3, %v799_v47  ;;  %v1581_v59 = vpop.xlane.xlu0 %348  ;;  %v1583_v4 = vsel %vm457_vm10, %v411_v34, %v412_v38  ;;  %v1585_v5 = vpop.xlane.xlu1 %351  ;;  %vm489_vm11 = vcmp.lt.s32.totalorder %v415_v40, %v416_v58  ;;  %v418_v55 = vsel %vm386_vm4, %v1264_v44, 2147483647  ;;  %vm388_vm12 = vcmp.eq.f32.partialorder %v1329_v3, %v1535_v36  ;;  %2163 = vst [vmem:[#allocation8_spill] sm:$0xff] %v1664_v54 }
  0xee   : > { %vm389_vm13 = vcmp.eq.f32.partialorder %v1341_v10, %v1581_v59  ;;  %vm2138_vm15 = vcmp.gt.f32.partialorder %v1581_v59, %v1563_v51  ;;  %v460_v15 = vshra.s32 %v1583_v4, 16  ;;  %vm390_vm1 = vcmp.eq.f32.partialorder %v1345_v11, %v1581_v59  ;;  %v1690_v10 = vld [vmem:[#allocation2 + $0x58] sm:$0xff] }
  0xef   : > { %v800_v0 = vsel %vm2138_vm15, %v1581_v59, %v1563_v51  ;;  %vm391_vm2 = vcmp.eq.f32.partialorder %v1349_v12, %v1585_v5  ;;  %vm2137_vm4 = vcmp.gt.f32.partialorder %v1585_v5, %v1574_v57  ;;  %v1625_v53 = vsel %vm489_vm11, %v415_v40, %v416_v58  ;;  %2164 = vst [vmem:[#allocation9_spill] sm:$0xff] %v1690_v10 }
  0xf0   : > { %816 = vst.msk [vmem:[#allocation2 + $0x30] sm:$0xff] %vm761_vm3, %v800_v0  ;;  %479 = vmin.xlane.f32.xlu0 %v1572_v56  ;;  %v1617_v49 = vcvt.s32.f32 %v460_v15  ;;  %v801_v16 = vsel %vm2137_vm4, %v1585_v5, %v1574_v57  ;;  %vm505_vm10 = vcmp.lt.s32.totalorder %v417_v14, %v418_v55  ;;  %v492_v24 = vshra.s32 %v1625_v53, 16 }
  0xf1   : > { %817 = vst.msk [vmem:[#allocation2 + $0x38] sm:$0xff] %vm761_vm3, %v801_v16  ;;  %v1628_v17 = vpop.xlane.xlu0 %354  ;;  %v1631_v26 = vsel %vm505_vm10, %v417_v14, %v418_v55  ;;  %v1635_v34 = vpop.xlane.xlu1 %357  ;;  %v419_v37 = vsel %vm387_vm7, %v1258_v39, 2147483647  ;;  %v420_v38 = vsel %vm388_vm12, %v1264_v44, 2147483647  ;;  %vm392_vm11 = vcmp.eq.f32.partialorder %v1353_v13, %v1585_v5 }
  0xf2   : > { %2161 = vst [vmem:[#allocation6_spill] sm:$0xff] %v1628_v17  ;;  %463 = vmin.xlane.f32.xlu1 %v1617_v49  ;;  %vm393_vm10 = vcmp.eq.f32.partialorder %v1365_v20, %v1628_v17  ;;  %vm2140_vm4 = vcmp.gt.f32.partialorder %v1628_v17, %v1613_v1  ;;  %v508_v40 = vshra.s32 %v1631_v26, 16  ;;  %vm394_vm7 = vcmp.eq.f32.partialorder %v1369_v21, %v1628_v17 }
  0xf3   : > { %v802_v2 = vsel %vm2140_vm4, %v1628_v17, %v1613_v1  ;;  %v1660_v3 = vcvt.s32.f32 %v492_v24  ;;  %vm395_vm12 = vcmp.eq.f32.partialorder %v1373_v22, %v1635_v34  ;;  %vm2141_vm15 = vcmp.gt.f32.partialorder %v1635_v34, %v1633_v27  ;;  %v1766_v1 = vld [vmem:[#allocation2 + $0x70] sm:$0xff] }
  0xf4   : > { %818 = vst.msk [vmem:[#allocation2 + $0x40] sm:$0xff] %vm761_vm3, %v802_v2  ;;  %v1667_v47 = vcvt.s32.f32 %v508_v40  ;;  %vm521_vm8 = vcmp.lt.s32.totalorder %v419_v37, %v420_v38  ;;  %v421_v58 = vsel %vm389_vm13, %v1258_v39, 2147483647  ;;  %vm396_vm4 = vcmp.eq.f32.partialorder %v1377_v23, %v1635_v34  ;;  %2167 = vst [vmem:[#allocation12_spill] sm:$0xff] %v1766_v1 }
  0xf5   : > { %v803_v14 = vsel %vm2141_vm15, %v1635_v34, %v1633_v27  ;;  %v1682_v55 = vpop.xlane.xlu0 %360  ;;  %v1684_v15 = vsel %vm521_vm8, %v419_v37, %v420_v38  ;;  %v422_v0 = vsel %vm390_vm1, %v1264_v44, 2147483647  ;;  %v1692_v16 = vpop.xlane.xlu1 %363  ;;  %v423_v11 = vsel %vm391_vm2, %v1258_v39, 2147483647  ;;  %v1715_v38 = vld [vmem:[#allocation2 + $0x60] sm:$0xff] }
  0xf6   : > { %495 = vmin.xlane.f32.xlu1 %v1660_v3  ;;  %511 = vmin.xlane.f32.xlu0 %v1667_v47  ;;  %819 = vst.msk [vmem:[#allocation2 + $0x48] sm:$0xff] %vm761_vm3, %v803_v14  ;;  %vm397_vm13 = vcmp.eq.f32.partialorder %v1389_v30, %v1682_v55  ;;  %vm2144_vm8 = vcmp.gt.f32.partialorder %v1682_v55, %v1664_v54  ;;  %v524_v24 = vshra.s32 %v1684_v15, 16  ;;  %2165 = vst [vmem:[#allocation10_spill] sm:$0xff] %v1715_v38 }
  0xf7   : > { %vm398_vm1 = vcmp.eq.f32.partialorder %v1393_v31, %v1682_v55  ;;  %v804_v37 = vsel %vm2144_vm8, %v1682_v55, %v1664_v54  ;;  %vm537_vm15 = vcmp.lt.s32.totalorder %v421_v58, %v422_v0  ;;  %vm399_vm5 = vcmp.eq.f32.partialorder %v1397_v32, %v1692_v16 }
  0xf8   : > { %820 = vst.msk [vmem:[#allocation2 + $0x50] sm:$0xff] %vm761_vm3, %v804_v37  ;;  %v1718_v40 = vcvt.s32.f32 %v524_v24  ;;  %v1720_v12 = vsel %vm537_vm15, %v421_v58, %v422_v0  ;;  %vm2143_vm2 = vcmp.gt.f32.partialorder %v1692_v16, %v1690_v10  ;;  %v424_v2 = vsel %vm392_vm11, %v1264_v44, 2147483647  ;;  %v1740_v0 = vld [vmem:[#allocation2 + $0x68] sm:$0xff] }
  0xf9   : > { %v540_v14 = vshra.s32 %v1720_v12, 16  ;;  %v805_v37 = vsel %vm2143_vm2, %v1692_v16, %v1690_v10  ;;  %v1734_v24 = vpop.xlane.xlu0 %366  ;;  %vm553_vm15 = vcmp.lt.s32.totalorder %v423_v11, %v424_v2  ;;  %v425_v58 = vsel %vm393_vm10, %v1258_v39, 2147483647  ;;  %2166 = vst [vmem:[#allocation11_spill] sm:$0xff] %v1740_v0  ;;  %v1742_v13 = vpop.xlane.xlu1 %369 }
  0xfa   : > { %527 = vmin.xlane.f32.xlu1 %v1718_v40  ;;  %vm400_vm11 = vcmp.eq.f32.partialorder %v1401_v33, %v1692_v16  ;;  %821 = vst.msk [vmem:[#allocation2 + $0x58] sm:$0xff] %vm761_vm3, %v805_v37  ;;  %vm401_vm2 = vcmp.eq.f32.partialorder %v1413_v41, %v1734_v24  ;;  %vm2150_vm8 = vcmp.gt.f32.partialorder %v1734_v24, %v1715_v38  ;;  %v426_v37 = vsel %vm394_vm7, %v1264_v44, 2147483647 }
  0xfb   : > { %v1752_v10 = vsel %vm553_vm15, %v423_v11, %v424_v2  ;;  %v1754_v20 = vcvt.s32.f32 %v540_v14  ;;  %v806_v54 = vsel %vm2150_vm8, %v1734_v24, %v1715_v38  ;;  %vm402_vm10 = vcmp.eq.f32.partialorder %v1417_v42, %v1734_v24 }
  0xfc   : > { %v556_v27 = vshra.s32 %v1752_v10, 16  ;;  %822 = vst.msk [vmem:[#allocation2 + $0x60] sm:$0xff] %vm761_vm3, %v806_v54  ;;  %vm569_vm15 = vcmp.lt.s32.totalorder %v425_v58, %v426_v37  ;;  %vm403_vm0 = vcmp.eq.f32.partialorder %v1421_v43, %v1742_v13  ;;  %vm2152_vm8 = vcmp.gt.f32.partialorder %v1742_v13, %v1740_v0 }
  0xfd   : > { %543 = vmin.xlane.f32.xlu0 %v1754_v20  ;;  %v1778_v21 = vsel %vm569_vm15, %v425_v58, %v426_v37  ;;  %v807_v2 = vsel %vm2152_vm8, %v1742_v13, %v1740_v0  ;;  %v1785_v54 = vpop.xlane.xlu0 %372  ;;  %v427_v14 = vsel %vm395_vm12, %v1258_v39, 2147483647  ;;  %vm404_vm7 = vcmp.eq.f32.partialorder %v1425_v45, %v1742_v13  ;;  %v1801_v58 = vpop.xlane.xlu1 %375 }
  0xfe   : > { %v1776_v11 = vcvt.s32.f32 %v556_v27  ;;  %v572_v38 = vshra.s32 %v1778_v21, 16  ;;  %823 = vst.msk [vmem:[#allocation2 + $0x68] sm:$0xff] %vm761_vm3, %v807_v2  ;;  %vm405_vm15 = vcmp.eq.f32.partialorder %v1437_v60, %v1785_v54  ;;  %vm2155_vm8 = vcmp.gt.f32.partialorder %v1785_v54, %v1766_v1  ;;  %v1799_v27 = vld [vmem:[#allocation2 + $0x78] sm:$0xff]  ;;  %2169 = vst [vmem:[#allocation14_spill] sm:$0xff] %v1801_v58 }
  0xff   : > { %2168 = vst [vmem:[#allocation13_spill] sm:$0xff] %v1799_v27  ;;  %v808_v22 = vsel %vm2155_vm8, %v1785_v54, %v1766_v1  ;;  %v428_v37 = vsel %vm396_vm4, %v1264_v44, 2147483647  ;;  %v429_v2 = vsel %vm397_vm13, %v1258_v39, 2147483647  ;;  %vm406_vm12 = vcmp.eq.f32.partialorder %v1441_v61, %v1785_v54 }
 0x100   : > { %559 = vmin.xlane.f32.xlu1 %v1776_v11  ;;  %v430_v0 = vsel %vm398_vm1, %v1264_v44, 2147483647  ;;  %v1821_v17 = vcvt.s32.f32 %v572_v38  ;;  %824 = vst.msk [vmem:[#allocation2 + $0x70] sm:$0xff] %vm761_vm3, %v808_v22  ;;  %vm585_vm8 = vcmp.lt.s32.totalorder %v427_v14, %v428_v37  ;;  %vm407_vm4 = vcmp.eq.f32.partialorder %v1445_v62, %v1801_v58 }
 0x101   : > { %vm601_vm14 = vcmp.lt.s32.totalorder %v429_v2, %v430_v0  ;;  %v1826_v23 = vsel %vm585_vm8, %v427_v14, %v428_v37  ;;  %vm728_vm13 = vcmp.gt.f32.partialorder %v1801_v58, %v1799_v27  ;;  %v432_v14 = vsel %vm400_vm11, %v1264_v44, 2147483647 }
 0x102   : > { %v1828_v1 = vsel %vm601_vm14, %v429_v2, %v430_v0  ;;  %575 = vmin.xlane.f32.xlu0 %v1821_v17  ;;  %v588_v30 = vshra.s32 %v1826_v23, 16  ;;  %v809_v38 = vsel %vm728_vm13, %v1801_v58, %v1799_v27  ;;  %v431_v0 = vsel %vm399_vm5, %v1258_v39, 2147483647 }
 0x103   : > { %v604_v31 = vshra.s32 %v1828_v1, 16  ;;  %vm408_vm14 = vcmp.eq.f32.partialorder %v1449_v63, %v1801_v58  ;;  %825 = vst.msk [vmem:[#allocation2 + $0x78] sm:$0xff] %vm761_vm3, %v809_v38  ;;  %v433_v22 = vsel %vm401_vm2, %v1258_v39, 2147483647  ;;  %v434_v32 = vsel %vm402_vm10, %v1264_v44, 2147483647 }
 0x104   : > { %v1861_v37 = vcvt.s32.f32 %v588_v30  ;;  %vm617_vm5 = vcmp.lt.s32.totalorder %v431_v0, %v432_v14  ;;  %vm633_vm8 = vcmp.lt.s32.totalorder %v433_v22, %v434_v32  ;;  %v435_v41 = vsel %vm403_vm0, %v1258_v39, 2147483647 }
 0x105   : > { %v1863_v2 = vcvt.s32.f32 %v604_v31  ;;  %v1865_v38 = vsel %vm617_vm5, %v431_v0, %v432_v14  ;;  %v1867_v33 = vsel %vm633_vm8, %v433_v22, %v434_v32  ;;  %v436_v42 = vsel %vm404_vm7, %v1264_v44, 2147483647 }
 0x106   : > { %591 = vmin.xlane.f32.xlu1 %v1861_v37  ;;  %v620_v30 = vshra.s32 %v1865_v38, 16  ;;  %v636_v31 = vshra.s32 %v1867_v33, 16  ;;  %vm649_vm1 = vcmp.lt.s32.totalorder %v435_v41, %v436_v42  ;;  %v437_v43 = vsel %vm405_vm15, %v1258_v39, 2147483647 }
 0x107   : > { %607 = vmin.xlane.f32.xlu0 %v1863_v2  ;;  %v1885_v0 = vsel %vm649_vm1, %v435_v41, %v436_v42  ;;  %v438_v45 = vsel %vm406_vm12, %v1264_v44, 2147483647  ;;  %v439_v14 = vsel %vm407_vm4, %v1258_v39, 2147483647  ;;  %v440_v22 = vsel %vm408_vm14, %v1264_v44, 2147483647 }
 0x108   : > { %v1899_v32 = vcvt.s32.f32 %v620_v30  ;;  %v1901_v60 = vcvt.s32.f32 %v636_v31  ;;  %v652_v41 = vshra.s32 %v1885_v0, 16  ;;  %vm665_vm0 = vcmp.lt.s32.totalorder %v437_v43, %v438_v45 }
 0x109   : > { %v1904_v42 = vsel %vm665_vm0, %v437_v43, %v438_v45  ;;  %vm681_vm2 = vcmp.lt.s32.totalorder %v439_v14, %v440_v22  ;;  %v443_v31 = vand.u32 65535, %v1516_v50 }
 0x10a   : > { %623 = vmin.xlane.f32.xlu1 %v1899_v32  ;;  %v1908_v39 = vcvt.s32.f32 %v652_v41  ;;  %v668_v61 = vshra.s32 %v1904_v42, 16  ;;  %v1911_v62 = vsel %vm681_vm2, %v439_v14, %v440_v22  ;;  %v475_v14 = vand.u32 65535, %v1527_v29 }
 0x10b   : > { %639 = vmin.xlane.f32.xlu0 %v1901_v60  ;;  %v684_v44 = vshra.s32 %v1911_v62, 16  ;;  %v445_v45 = vcvt.s32.f32 %v443_v31  ;;  %v459_v41 = vand.u32 65535, %v1583_v4  ;;  %v491_v31 = vand.u32 65535, %v1625_v53 }
 0x10c   : > { %v1914_v63 = vcvt.s32.f32 %v668_v61  ;;  %v507_v29 = vand.u32 65535, %v1631_v26 }
 0x10d   : > { %v1918_v30 = vcvt.s32.f32 %v684_v44  ;;  %v477_v44 = vcvt.s32.f32 %v475_v14  ;;  %v461_v50 = vcvt.s32.f32 %v459_v41  ;;  %v493_v14 = vcvt.s32.f32 %v491_v31 }
 0x10e   : > { %655 = vmin.xlane.f32.xlu1 %v1908_v39 }
 0x10f   : > { %671 = vmin.xlane.f32.xlu0 %v1914_v63 }
 0x112   : > { %687 = vmin.xlane.f32.xlu1 %v1918_v30 }
 0x179   : > { %v1922_v43 = vpop.xlane.xlu0 %447 }
 0x17a   : > { %vm449_vm11 = vcmp.eq.f32.partialorder %v1552_v46, %v1922_v43 }
 0x17b   : > { %v450_v22 = vsel %vm449_vm11, %v445_v45, inf }
 0x17c   : > { %451 = vmin.xlane.f32.xlu0 %v450_v22  ;;  %v523_v22 = vand.u32 65535, %v1684_v15  ;;  %v555_v15 = vand.u32 65535, %v1752_v10 }
 0x17d   : > { %v1928_v61 = vpop.xlane.xlu0 %479 }
 0x17e   : > { %vm481_vm10 = vcmp.eq.f32.partialorder %v1572_v56, %v1928_v61  ;;  %v509_v56 = vcvt.s32.f32 %v507_v29  ;;  %v525_v41 = vcvt.s32.f32 %v523_v22  ;;  %v557_v29 = vcvt.s32.f32 %v555_v15 }
 0x17f   : > { %v1932_v27 = vpop.xlane.xlu1 %463  ;;  %v482_v58 = vsel %vm481_vm10, %v477_v44, inf }
 0x180   : > { %vm465_vm7 = vcmp.eq.f32.partialorder %v1617_v49, %v1932_v27  ;;  %483 = vmin.xlane.f32.xlu0 %v482_v58  ;;  %v539_v49 = vand.u32 65535, %v1720_v12 }
 0x181   : > { %v466_v46 = vsel %vm465_vm7, %v461_v50, inf }
 0x182   : > { %467 = vmin.xlane.f32.xlu1 %v466_v46 }
 0x183   : > { %v1938_v4 = vpop.xlane.xlu1 %495  ;;  %v1940_v45 = vpop.xlane.xlu0 %511 }
 0x184   : > { %vm497_vm15 = vcmp.eq.f32.partialorder %v1660_v3, %v1938_v4  ;;  %vm513_vm12 = vcmp.eq.f32.partialorder %v1667_v47, %v1940_v45  ;;  %v541_v3 = vcvt.s32.f32 %v539_v49  ;;  %v571_v47 = vand.u32 65535, %v1778_v21 }
 0x185   : > { %v498_v53 = vsel %vm497_vm15, %v493_v14, inf  ;;  %v514_v26 = vsel %vm513_vm12, %v509_v56, inf  ;;  %v587_v14 = vand.u32 65535, %v1826_v23  ;;  %v603_v56 = vand.u32 65535, %v1828_v1 }
 0x186   : > { %499 = vmin.xlane.f32.xlu1 %v498_v53  ;;  %515 = vmin.xlane.f32.xlu0 %v514_v26  ;;  %v573_v46 = vcvt.s32.f32 %v571_v47  ;;  %v619_v26 = vand.u32 65535, %v1865_v38  ;;  %v635_v49 = vand.u32 65535, %v1867_v33  ;;  %v651_v38 = vand.u32 65535, %v1885_v0 }
 0x187   : > { %v1948_v58 = vpop.xlane.xlu1 %527  ;;  %v589_v53 = vcvt.s32.f32 %v587_v14  ;;  %v667_v33 = vand.u32 65535, %v1904_v42  ;;  %v683_v0 = vand.u32 65535, %v1911_v62  ;;  %v454_v62 = vcvt.f32.s32 %v1922_v43 }
 0x188   : > { %vm529_vm4 = vcmp.eq.f32.partialorder %v1718_v40, %v1948_v58  ;;  %v621_v15 = vcvt.s32.f32 %v619_v26  ;;  %v518_v43 = vcvt.f32.s32 %v1940_v45  ;;  %v534_v45 = vcvt.f32.s32 %v1948_v58 }
 0x189   : > { %v530_v44 = vsel %vm529_vm4, %v525_v41, inf  ;;  %vm2172_vm12 = vcmp.gt.f32.partialorder %v1533_v35, %v1514_v25  ;;  %vm2173_vm4 = vcmp.gt.f32.partialorder %v1535_v36, %v1525_v28 }
 0x18a   : > { %v1953_v50 = vpop.xlane.xlu0 %543  ;;  %531 = vmin.xlane.f32.xlu1 %v530_v44  ;;  %v637_v44 = vcvt.s32.f32 %v635_v49  ;;  %v519_v8 = vshll.u32 %v518_v43, 16 }
 0x18b   : > { %vm545_vm14 = vcmp.eq.f32.partialorder %v1754_v20, %v1953_v50 }
 0x18c   : > { %v546_v31 = vsel %vm545_vm14, %v541_v3, inf  ;;  %vm2174_vm14 = vcmp.gt.f32.partialorder %v1581_v59, %v1563_v51 }
 0x18d   : > { %v1958_v12 = vpop.xlane.xlu1 %559  ;;  %547 = vmin.xlane.f32.xlu0 %v546_v31  ;;  %v653_v31 = vcvt.s32.f32 %v651_v38 }
 0x18e   : > { %vm561_vm5 = vcmp.eq.f32.partialorder %v1776_v11, %v1958_v12  ;;  %v605_v11 = vcvt.s32.f32 %v603_v56  ;;  %v455_v56 = vshll.u32 %v454_v62, 16 }
 0x18f   : > { %v562_v40 = vsel %vm561_vm5, %v557_v29, inf  ;;  %v1962_v10 = vpop.xlane.xlu0 %575  ;;  %v669_v29 = vcvt.s32.f32 %v667_v33  ;;  %vm2175_vm5 = vcmp.gt.f32.partialorder %v1585_v5, %v1574_v57  ;;  %v738_v57 = vld [vmem:[#allocation3 + $0x48] sm:$0xff]  ;;  %v739_v5 = vld [vmem:[#allocation3 + $0x50] sm:$0xff] }
 0x190   : > { %563 = vmin.xlane.f32.xlu1 %v562_v40  ;;  %vm577_vm8 = vcmp.eq.f32.partialorder %v1821_v17, %v1962_v10  ;;  %v685_v40 = vcvt.s32.f32 %v683_v0 }
 0x191   : > { %v578_v20 = vsel %vm577_vm8, %v573_v46, inf }
 0x192   : > { %579 = vmin.xlane.f32.xlu0 %v578_v20 }
 0x193   : > { %v1968_v21 = vpop.xlane.xlu1 %591 }
 0x194   : > { %v1970_v22 = vpop.xlane.xlu0 %607  ;;  %vm593_vm1 = vcmp.eq.f32.partialorder %v1861_v37, %v1968_v21 }
 0x195   : > { %vm609_vm0 = vcmp.eq.f32.partialorder %v1863_v2, %v1970_v22  ;;  %v594_v1 = vsel %vm593_vm1, %v589_v53, inf  ;;  %v470_v53 = vcvt.f32.s32 %v1932_v27  ;;  %v730_v27 = vld [vmem:[#allocation3 + $0x8] sm:$0xff]  ;;  %v614_v28 = vcvt.f32.s32 %v1970_v22 }
 0x196   : > { %v610_v17 = vsel %vm609_vm0, %v605_v11, inf  ;;  %595 = vmin.xlane.f32.xlu1 %v594_v1  ;;  %v2176_v22 = vld [vmem:[#allocation6_spill] sm:$0xff] }
 0x197   : > { %611 = vmin.xlane.f32.xlu0 %v610_v17  ;;  %v1978_v23 = vpop.xlane.xlu1 %623  ;;  %v502_v17 = vcvt.f32.s32 %v1938_v4 }
 0x198   : > { %v1980_v41 = vpop.xlane.xlu0 %639  ;;  %vm625_vm2 = vcmp.eq.f32.partialorder %v1899_v32, %v1978_v23  ;;  %v630_v51 = vcvt.f32.s32 %v1978_v23 }
 0x199   : > { %vm641_vm11 = vcmp.eq.f32.partialorder %v1901_v60, %v1980_v41  ;;  %v626_v37 = vsel %vm625_vm2, %v621_v15, inf  ;;  %v503_v6 = vshll.u32 %v502_v17, 16  ;;  %v646_v59 = vcvt.f32.s32 %v1980_v41 }
 0x19a   : > { %v642_v2 = vsel %vm641_vm11, %v637_v44, inf  ;;  %627 = vmin.xlane.f32.xlu1 %v626_v37  ;;  %v471_v44 = vshll.u32 %v470_v53, 16 }
 0x19b   : > { %643 = vmin.xlane.f32.xlu0 %v642_v2  ;;  %v1988_v3 = vpop.xlane.xlu1 %655 }
 0x19c   : > { %v1990_v47 = vpop.xlane.xlu0 %671  ;;  %vm657_vm10 = vcmp.eq.f32.partialorder %v1908_v39, %v1988_v3  ;;  %v486_v39 = vcvt.f32.s32 %v1928_v61  ;;  %v731_v61 = vld [vmem:[#allocation3 + $0x10] sm:$0xff]  ;;  %v662_v23 = vcvt.f32.s32 %v1988_v3  ;;  %v741_v3 = vld [vmem:[#allocation3 + $0x60] sm:$0xff] }
 0x19d   : > { %vm673_vm7 = vcmp.eq.f32.partialorder %v1914_v63, %v1990_v47  ;;  %v658_v32 = vsel %vm657_vm10, %v653_v31, inf  ;;  %v729_v63 = vld [vmem:[#allocation3] sm:$0xff]  ;;  %v678_v41 = vcvt.f32.s32 %v1990_v47 }
 0x19e   : > { %v674_v60 = vsel %vm673_vm7, %v669_v29, inf  ;;  %659 = vmin.xlane.f32.xlu1 %v658_v32  ;;  %v487_v49 = vshll.u32 %v486_v39, 16  ;;  %v734_v39 = vld [vmem:[#allocation3 + $0x28] sm:$0xff] }
 0x19f   : > { %675 = vmin.xlane.f32.xlu0 %v674_v60  ;;  %v1997_v42 = vpop.xlane.xlu1 %687  ;;  %v732_v60 = vld [vmem:[#allocation3 + $0x18] sm:$0xff] }
 0x1a0   : > { %vm689_vm15 = vcmp.eq.f32.partialorder %v1918_v30, %v1997_v42 }
 0x1a1   : > { %v690_v46 = vsel %vm689_vm15, %v685_v40, inf  ;;  %v733_v40 = vld [vmem:[#allocation3 + $0x20] sm:$0xff] }
 0x1a2   : > { %691 = vmin.xlane.f32.xlu1 %v690_v46  ;;  %v550_v46 = vcvt.f32.s32 %v1953_v50 }
 0x209   : > { %v452_v14 = vpop.xlane.xlu0 %451 }
 0x20a   : > { %v453_v20 = vcvt.f32.s32 %v452_v14  ;;  %v535_v14 = vshll.u32 %v534_v45, 16  ;;  %v631_v45 = vshll.u32 %v630_v51, 16 }
 0x20c   : > { %v456_v11 = vadd.s32 %v455_v56, %v453_v20  ;;  %v566_v56 = vcvt.f32.s32 %v1958_v12 }
 0x20d   : > { %v484_v26 = vpop.xlane.xlu0 %483 }
 0x20e   : > { %v745_v1 = vsel %vm713_vm6, %v456_v11, %v729_v63  ;;  %v485_v30 = vcvt.f32.s32 %v484_v26  ;;  %vm2170_vm6 = vcmp.gt.f32.partialorder %v1495_v18, %v1480_v48  ;;  %v551_v63 = vshll.u32 %v550_v46, 16 }
 0x20f   : > { %762 = vst.msk [vmem:[#allocation3] sm:$0xff] %vm761_vm3, %v745_v1  ;;  %v468_v15 = vpop.xlane.xlu1 %467  ;;  %v582_v11 = vcvt.f32.s32 %v1962_v10  ;;  %v567_v35 = vshll.u32 %v566_v56, 16  ;;  %v598_v1 = vcvt.f32.s32 %v1968_v21  ;;  %v694_v56 = vcvt.f32.s32 %v1997_v42 }
 0x210   : > { %v469_v38 = vcvt.f32.s32 %v468_v15  ;;  %v488_v33 = vadd.s32 %v487_v49, %v485_v30  ;;  %v736_v49 = vld [vmem:[#allocation3 + $0x38] sm:$0xff] }
 0x211   : > { %v583_v43 = vshll.u32 %v582_v11, 16 }
 0x212   : > { %v472_v37 = vadd.s32 %v471_v44, %v469_v38  ;;  %v747_v2 = vsel %vm715_vm9, %v488_v33, %v731_v61  ;;  %vm2171_vm9 = vcmp.gt.f32.partialorder %v1497_v19, %v1482_v52  ;;  %v735_v19 = vld [vmem:[#allocation3 + $0x30] sm:$0xff]  ;;  %v737_v61 = vld [vmem:[#allocation3 + $0x40] sm:$0xff]  ;;  %v599_v44 = vshll.u32 %v598_v1, 16 }
 0x213   : > { %764 = vst.msk [vmem:[#allocation3 + $0x10] sm:$0xff] %vm761_vm3, %v747_v2  ;;  %v500_v4 = vpop.xlane.xlu1 %499  ;;  %v516_v31 = vpop.xlane.xlu0 %515 }
 0x214   : > { %v746_v29 = vsel %vm2170_vm6, %v472_v37, %v730_v27  ;;  %v501_v0 = vcvt.f32.s32 %v500_v4  ;;  %v517_v32 = vcvt.f32.s32 %v516_v31  ;;  %v615_v27 = vshll.u32 %v614_v28, 16  ;;  %v2177_v37 = vld [vmem:[#allocation5_spill] sm:$0xff] }
 0x215   : > { %763 = vst.msk [vmem:[#allocation3 + $0x8] sm:$0xff] %vm761_vm3, %v746_v29  ;;  %vm2178_vm8 = vcmp.gt.f32.partialorder %v2176_v22, %v2177_v37  ;;  %v647_v29 = vshll.u32 %v646_v59, 16 }
 0x216   : > { %v504_v7 = vadd.s32 %v503_v6, %v501_v0  ;;  %v520_v9 = vadd.s32 %v519_v8, %v517_v32 }
 0x217   : > { %v532_v62 = vpop.xlane.xlu1 %531 }
 0x218   : > { %v748_v58 = vsel %vm2171_vm9, %v504_v7, %v732_v60  ;;  %v749_v48 = vsel %vm2172_vm12, %v520_v9, %v733_v40  ;;  %v533_v18 = vcvt.f32.s32 %v532_v62  ;;  %v2179_v60 = vld [vmem:[#allocation7_spill] sm:$0xff]  ;;  %v2181_v7 = vld [vmem:[#allocation8_spill] sm:$0xff] }
 0x219   : > { %765 = vst.msk [vmem:[#allocation3 + $0x18] sm:$0xff] %vm761_vm3, %v748_v58  ;;  %766 = vst.msk [vmem:[#allocation3 + $0x20] sm:$0xff] %vm761_vm3, %v749_v48  ;;  %vm2180_vm1 = vcmp.gt.f32.partialorder %v1635_v34, %v2179_v60  ;;  %vm2182_vm0 = vcmp.gt.f32.partialorder %v1682_v55, %v2181_v7  ;;  %v663_v48 = vshll.u32 %v662_v23, 16 }
 0x21a   : > { %v536_v20 = vadd.s32 %v535_v14, %v533_v18  ;;  %v548_v50 = vpop.xlane.xlu0 %547  ;;  %v740_v14 = vld [vmem:[#allocation3 + $0x58] sm:$0xff]  ;;  %v679_v18 = vshll.u32 %v678_v41, 16 }
 0x21b   : > { %v549_v53 = vcvt.f32.s32 %v548_v50  ;;  %v2185_v50 = vld [vmem:[#allocation10_spill] sm:$0xff] }
 0x21c   : > { %v750_v52 = vsel %vm2173_vm4, %v536_v20, %v734_v39  ;;  %v2183_v20 = vld [vmem:[#allocation9_spill] sm:$0xff]  ;;  %vm2186_vm11 = vcmp.gt.f32.partialorder %v1734_v24, %v2185_v50 }
 0x21d   : > { %v564_v25 = vpop.xlane.xlu1 %563  ;;  %767 = vst.msk [vmem:[#allocation3 + $0x28] sm:$0xff] %vm761_vm3, %v750_v52  ;;  %v552_v12 = vadd.s32 %v551_v63, %v549_v53  ;;  %vm2184_vm2 = vcmp.gt.f32.partialorder %v1692_v16, %v2183_v20  ;;  %v742_v52 = vld [vmem:[#allocation3 + $0x68] sm:$0xff] }
 0x21e   : > { %v565_v26 = vcvt.f32.s32 %v564_v25 }
 0x21f   : > { %v751_v30 = vsel %vm2174_vm14, %v552_v12, %v735_v19  ;;  %v580_v10 = vpop.xlane.xlu0 %579  ;;  %v743_v19 = vld [vmem:[#allocation3 + $0x70] sm:$0xff]  ;;  %v695_v12 = vshll.u32 %v694_v56, 16 }
 0x220   : > { %v568_v17 = vadd.s32 %v567_v35, %v565_v26  ;;  %768 = vst.msk [vmem:[#allocation3 + $0x30] sm:$0xff] %vm761_vm3, %v751_v30  ;;  %v581_v36 = vcvt.f32.s32 %v580_v10  ;;  %v2187_v26 = vld [vmem:[#allocation11_spill] sm:$0xff]  ;;  %v744_v30 = vld [vmem:[#allocation3 + $0x78] sm:$0xff] }
 0x221   : > { %vm2188_vm10 = vcmp.gt.f32.partialorder %v1742_v13, %v2187_v26  ;;  %v830_v13 = vld [vmem:[#allocation3] sm:$0xff] (!%p954_p12) }
 0x222   : > { %v752_v15 = vsel %vm2175_vm5, %v568_v17, %v736_v49  ;;  %v584_v21 = vadd.s32 %v583_v43, %v581_v36  ;;  %v2189_v49 = vld [vmem:[#allocation12_spill] sm:$0xff]  ;;  %v832_v36 = vld [vmem:[#allocation3 + $0x10] sm:$0xff] (!%p954_p12)  ;;  %846 = vst.msk [vmem:[%s1219_s16] sm:$0xff] (!%p954_p12), %vm761_vm3, %v830_v13 }
 0x223   : > { %769 = vst.msk [vmem:[#allocation3 + $0x38] sm:$0xff] %vm761_vm3, %v752_v15  ;;  %v596_v38 = vpop.xlane.xlu1 %595  ;;  %vm2190_vm7 = vcmp.gt.f32.partialorder %v1785_v54, %v2189_v49  ;;  %v831_v54 = vld [vmem:[#allocation3 + $0x8] sm:$0xff] (!%p954_p12)  ;;  %848 = vst.msk [vmem:[%s1219_s16 + $0x10] sm:$0xff] (!%p954_p12), %vm761_vm3, %v832_v36  ;;  %v833_v15 = vld [vmem:[#allocation3 + $0x18] sm:$0xff] (!%p954_p12) }
 0x224   : > { %v612_v33 = vpop.xlane.xlu0 %611  ;;  %v753_v2 = vsel %vm2178_vm8, %v584_v21, %v737_v61  ;;  %v597_v6 = vcvt.f32.s32 %v596_v38  ;;  %847 = vst.msk [vmem:[%s1219_s16 + $0x8] sm:$0xff] (!%p954_p12), %vm761_vm3, %v831_v54  ;;  %v834_v61 = vld [vmem:[#allocation3 + $0x20] sm:$0xff] (!%p954_p12)  ;;  %v835_v21 = vld [vmem:[#allocation3 + $0x28] sm:$0xff] (!%p954_p12)  ;;  %849 = vst.msk [vmem:[%s1219_s16 + $0x18] sm:$0xff] (!%p954_p12), %vm761_vm3, %v833_v15 }
 0x225   : > { %v613_v8 = vcvt.f32.s32 %v612_v33  ;;  %770 = vst.msk [vmem:[#allocation3 + $0x40] sm:$0xff] %vm761_vm3, %v753_v2  ;;  %850 = vst.msk [vmem:[%s1219_s16 + $0x20] sm:$0xff] (!%p954_p12), %vm761_vm3, %v834_v61 }
 0x226   : > { %v600_v4 = vadd.s32 %v599_v44, %v597_v6  ;;  %851 = vst.msk [vmem:[%s1219_s16 + $0x28] sm:$0xff] (!%p954_p12), %vm761_vm3, %v835_v21 }
 0x227   : > { %v616_v31 = vadd.s32 %v615_v27, %v613_v8  ;;  %v628_v0 = vpop.xlane.xlu1 %627  ;;  %v836_v44 = vld [vmem:[#allocation3 + $0x30] sm:$0xff] (!%p954_p12) }
 0x228   : > { %v644_v32 = vpop.xlane.xlu0 %643  ;;  %v754_v40 = vsel %vm2180_vm1, %v600_v4, %v738_v57  ;;  %v629_v46 = vcvt.f32.s32 %v628_v0  ;;  %852 = vst.msk [vmem:[%s1219_s16 + $0x30] sm:$0xff] (!%p954_p12), %vm761_vm3, %v836_v44 }
 0x229   : > { %v755_v9 = vsel %vm2182_vm0, %v616_v31, %v739_v5  ;;  %v645_v62 = vcvt.f32.s32 %v644_v32  ;;  %771 = vst.msk [vmem:[#allocation3 + $0x48] sm:$0xff] %vm761_vm3, %v754_v40 }
 0x22a   : > { %772 = vst.msk [vmem:[#allocation3 + $0x50] sm:$0xff] %vm761_vm3, %v755_v9  ;;  %v632_v58 = vadd.s32 %v631_v45, %v629_v46  ;;  %v837_v51 = vld [vmem:[#allocation3 + $0x38] sm:$0xff] (!%p954_p12) }
 0x22b   : > { %v648_v47 = vadd.s32 %v647_v29, %v645_v62  ;;  %v660_v34 = vpop.xlane.xlu1 %659  ;;  %853 = vst.msk [vmem:[%s1219_s16 + $0x38] sm:$0xff] (!%p954_p12), %vm761_vm3, %v837_v51 }
 0x22c   : > { %v676_v39 = vpop.xlane.xlu0 %675  ;;  %v756_v55 = vsel %vm2184_vm2, %v632_v58, %v740_v14  ;;  %v661_v53 = vcvt.f32.s32 %v660_v34  ;;  %v838_v59 = vld [vmem:[#allocation3 + $0x40] sm:$0xff] (!%p954_p12) }
 0x22d   : > { %v757_v63 = vsel %vm2186_vm11, %v648_v47, %v741_v3  ;;  %v677_v11 = vcvt.f32.s32 %v676_v39  ;;  %773 = vst.msk [vmem:[#allocation3 + $0x58] sm:$0xff] %vm761_vm3, %v756_v55  ;;  %854 = vst.msk [vmem:[%s1219_s16 + $0x40] sm:$0xff] (!%p954_p12), %vm761_vm3, %v838_v59 }
 0x22e   : > { %774 = vst.msk [vmem:[#allocation3 + $0x60] sm:$0xff] %vm761_vm3, %v757_v63  ;;  %v664_v25 = vadd.s32 %v663_v48, %v661_v53 }
 0x22f   : > { %v680_v42 = vadd.s32 %v679_v18, %v677_v11  ;;  %v692_v35 = vpop.xlane.xlu1 %691  ;;  %829 = sbr.rel (%p954_p12) target bundleno = 574 (0x23e), region = 55 }
 0x230   : > { %v758_v16 = vsel %vm2188_vm10, %v664_v25, %v742_v52  ;;  %v693_v1 = vcvt.f32.s32 %v692_v35  ;;  %v839_v38 = vld [vmem:[#allocation3 + $0x48] sm:$0xff] (!%p954_p12) }
 0x231   : > { %v759_v24 = vsel %vm2190_vm7, %v680_v42, %v743_v19  ;;  %775 = vst.msk [vmem:[#allocation3 + $0x68] sm:$0xff] %vm761_vm3, %v758_v16  ;;  %v840_v33 = vld [vmem:[#allocation3 + $0x50] sm:$0xff] (!%p954_p12)  ;;  %855 = vst.msk [vmem:[%s1219_s16 + $0x48] sm:$0xff] (!%p954_p12), %vm761_vm3, %v839_v38 }
 0x232   : > { %776 = vst.msk [vmem:[#allocation3 + $0x70] sm:$0xff] %vm761_vm3, %v759_v24  ;;  %v696_v17 = vadd.s32 %v695_v12, %v693_v1  ;;  %856 = vst.msk [vmem:[%s1219_s16 + $0x50] sm:$0xff] (!%p954_p12), %vm761_vm3, %v840_v33 }
 0x234   : > { %v760_v28 = vsel %vm728_vm13, %v696_v17, %v744_v30  ;;  %v841_v27 = vld [vmem:[#allocation3 + $0x58] sm:$0xff] (!%p954_p12) }
 0x235   : > { %777 = vst.msk [vmem:[#allocation3 + $0x78] sm:$0xff] %vm761_vm3, %v760_v28  ;;  %857 = vst.msk [vmem:[%s1219_s16 + $0x58] sm:$0xff] (!%p954_p12), %vm761_vm3, %v841_v27  ;;  %v842_v22 = vld [vmem:[#allocation3 + $0x60] sm:$0xff] (!%p954_p12) }
 0x236   : > { %858 = vst.msk [vmem:[%s1219_s16 + $0x60] sm:$0xff] %vm761_vm3, %v842_v22 }
 0x238   : > { %v843_v37 = vld [vmem:[#allocation3 + $0x68] sm:$0xff] }
 0x239   : > { %v844_v2 = vld [vmem:[#allocation3 + $0x70] sm:$0xff]  ;;  %859 = vst.msk [vmem:[%s1219_s16 + $0x68] sm:$0xff] %vm761_vm3, %v843_v37 }
 0x23a   : > { %860 = vst.msk [vmem:[%s1219_s16 + $0x70] sm:$0xff] %vm761_vm3, %v844_v2 }
 0x23c   : > { %v845_v6 = vld [vmem:[#allocation3 + $0x78] sm:$0xff] }
 0x23d   : > { %861 = vst.msk [vmem:[%s1219_s16 + $0x78] sm:$0xff] %vm761_vm3, %v845_v6 }
 0x23e PF: > { %s11_s12 = sadd.s32 1, %s1070_s12   ;;  %s2193_s6 = smov %s1050_s7 }
 0x23f   : > { %p8_p13 = scmp.ge.s32.totalorder %s11_s12, 10   ;;  %s2194_s7 = smov %s1135_s19 }
 0x240   : > { %s2195_s8 = smov %s1062_s10  ;;  %s2196_s9 = smov %s1066_s11 }
 0x241   : > { %s2197_s10 = smov %s2200_s13  ;;  %s2198_s11 = smov %s2204_s14 }
 0x242   :  { %10 = sbr.rel (!%p8_p13) target bundleno = 4 (0x4), region = 90 }

</bundles_post_ra>
